<compile_context>
chip_gen: v6e
topology: v6e:2x2x1
jax: 0.10.0
libtpu: 0.0.40
codegen_flags: <defaults>
</compile_context>

<pallas_src>
import functools

import jax
import jax.numpy as jnp
from jax.experimental import pallas as pl
from jax.experimental.pallas import tpu as pltpu

BN_EPS = 1e-5


def _splitmix32(x):
    """Avalanching finalizer for uint32 counters (splitmix32-style)."""
    x = x ^ (x >> 16)
    x = x * jnp.uint32(0x7FEB352D)
    x = x ^ (x >> 15)
    x = x * jnp.uint32(0x846CA68B)
    x = x ^ (x >> 16)
    return x


def _decoder_kernel(seed_ref, z_full_ref, z_col_ref, gamma_ref, beta_ref, out_ref,
                    *, dropout_p, n_rows, n_cols, tn):
    # --- z @ z.T column tile on the MXU (contract on D; no explicit transpose) ---
    zf = z_full_ref[...].astype(jnp.float32)        # [N,  D]  resident across tiles
    zc = z_col_ref[...].astype(jnp.float32)         # [TN, D]  current column tile
    h = jax.lax.dot_general(
        zf, zc, dimension_numbers=(((1,), (1,)), ((), ())),
        preferred_element_type=jnp.float32)         # [N, TN]

    # --- activation (sigmoid) on the EUP ---
    h = jax.nn.sigmoid(h)

    # --- BatchNorm1d (training): per-column stats over rows, biased variance ---
    # Single pass (var = E[h^2] - mean^2), affine folded into scale/shift.
    inv_n = jnp.float32(1.0 / n_rows)
    mean = jnp.sum(h, axis=0, keepdims=True) * inv_n            # [1, TN]
    mean_sq = jnp.sum(h * h, axis=0, keepdims=True) * inv_n     # [1, TN]
    var = mean_sq - mean * mean
    scale = gamma_ref[...] * jax.lax.rsqrt(var + BN_EPS)        # [1, TN]
    shift = beta_ref[...] - mean * scale                        # [1, TN]

    if dropout_p > 0.0:
        # --- Dropout fused with BN: y = where(keep, h*a + b, 0); a/b carry 1/(1-p).
        inv_keep = jnp.float32(1.0 / (1.0 - dropout_p))
        a = scale * inv_keep
        b = shift * inv_keep

        # Counter-based PRNG over the GLOBAL element index -> masks are independent
        # across column tiles without reseeding; keep-test stays in integer domain.
        col0 = (pl.program_id(0) * tn).astype(jnp.uint32)
        rows = jax.lax.broadcasted_iota(jnp.uint32, h.shape, 0)
        cols = jax.lax.broadcasted_iota(jnp.uint32, h.shape, 1) + col0
        idx = rows * jnp.uint32(n_cols) + cols
        seed_u = seed_ref[0].astype(jnp.uint32) * jnp.uint32(0x9E3779B9)
        bits = _splitmix32(idx ^ seed_u)
        thresh = jnp.uint32(min(int(round(dropout_p * 4294967296.0)), 4294967295))
        keep = bits >= thresh                                   # P(keep) = 1 - p
        out = jnp.where(keep, h * a + b, 0.0)
    else:
        out = h * scale + shift

    out_ref[...] = out.astype(out_ref.dtype)


def _pick_tn(n):
    """Largest lane-dense column tile (multiple of 128) dividing N, else full N."""
    for tn in (512, 256, 128):
        if n % tn == 0:
            return tn
    return n


def decoder_layer(z, gamma, beta, seed, dropout_p=0.1):
    """z: [N, D] float32; gamma, beta: [N] float32; seed: python int."""
    n, d = z.shape
    z = z.astype(jnp.float32)
    tn = _pick_tn(n)
    grid = (n // tn,)

    gamma2 = gamma.reshape(1, n).astype(jnp.float32)
    beta2 = beta.reshape(1, n).astype(jnp.float32)
    seed_arr = jnp.asarray([seed], dtype=jnp.int32)

    kernel = functools.partial(
        _decoder_kernel, dropout_p=float(dropout_p), n_rows=n, n_cols=n, tn=tn)

    cost = pl.CostEstimate(
        flops=2 * n * n * d + 10 * n * n,
        transcendentals=n * n,
        bytes_accessed=4 * (2 * n * d + 2 * n + n * n),
    )

    return pl.pallas_call(
        kernel,
        out_shape=jax.ShapeDtypeStruct((n, n), jnp.float32),
        grid_spec=pltpu.PrefetchScalarGridSpec(
            num_scalar_prefetch=1,
            grid=grid,
            in_specs=[
                pl.BlockSpec((n, d), lambda j, seed: (0, 0)),    # z (resident LHS)
                pl.BlockSpec((tn, d), lambda j, seed: (j, 0)),   # z column tile (RHS)
                pl.BlockSpec((1, tn), lambda j, seed: (0, j)),   # gamma slice
                pl.BlockSpec((1, tn), lambda j, seed: (0, j)),   # beta slice
            ],
            out_specs=pl.BlockSpec((n, tn), lambda j, seed: (0, j)),
        ),
        compiler_params=pltpu.CompilerParams(
            dimension_semantics=("parallel",),       # column tiles are independent
            vmem_limit_bytes=32 * 1024 * 1024,
        ),
        cost_estimate=cost,
    )(seed_arr, z, z, gamma2, beta2)


def _reference(z, gamma, beta):
    """Pure-JAX reference for everything except the dropout mask draw."""
    h = z @ z.T
    h = jax.nn.sigmoid(h)
    mean = jnp.mean(h, axis=0, keepdims=True)
    var = jnp.mean((h - mean) ** 2, axis=0, keepdims=True)
    h = (h - mean) / jnp.sqrt(var + BN_EPS)
    return h * gamma[None, :] + beta[None, :]


if __name__ == "__main__":
    key = jax.random.PRNGKey(0)
    k_z, k_g, k_b = jax.random.split(key, 3)

    # N nodes (== BatchNorm1d num_features), latent dim D. N is a multiple of 128
    # so the grid actually tiles (TN=128, grid=(2,)) and stores are lane-dense.
    N, D = 256, 32
    dropout_p = 0.1

    z = jax.random.normal(k_z, (N, D), dtype=jnp.float32)
    gamma = 1.0 + 0.1 * jax.random.normal(k_g, (N,), dtype=jnp.float32)
    beta = 0.1 * jax.random.normal(k_b, (N,), dtype=jnp.float32)

    ref = _reference(z, gamma, beta)

    # 1) No-dropout run must match the pure-JAX reference.
    out_nodrop = decoder_layer(z, gamma, beta, seed=0, dropout_p=0.0)
    out_nodrop = jax.block_until_ready(out_nodrop)
    assert out_nodrop.shape == (N, N) and out_nodrop.dtype == jnp.float32
    assert jnp.allclose(out_nodrop, ref, atol=2e-3, rtol=2e-3)

    # 2) Dropout run: every element is either exactly 0 (dropped) or ref/(1-p) (kept).
    out = decoder_layer(z, gamma, beta, seed=1234, dropout_p=dropout_p)
    out = jax.block_until_ready(out)
    assert out.shape == (N, N) and out.dtype == jnp.float32
    scaled_ref = ref / (1.0 - dropout_p)
    is_zero = jnp.abs(out) < 1e-6
    is_kept = jnp.abs(out - scaled_ref) <= (1e-3 + 1e-3 * jnp.abs(scaled_ref))
    assert bool(jnp.all(is_zero | is_kept))
    keep_frac = float(1.0 - jnp.mean(is_zero.astype(jnp.float32)))
    assert 0.80 <= keep_frac <= 0.98  # ~Bernoulli(0.9) over 65536 draws

    print("KERNEL_OK")
</pallas_src>

<mosaic_0001>
module attributes {stable_mosaic.version = 11 : i64} {
  func.func @_decoder_kernel(%arg0: i32, %arg1: memref<1xi32, #tpu.memory_space<smem>>, %arg2: memref<256x32xf32, #tpu.memory_space<vmem>>, %arg3: memref<256x32xf32, #tpu.memory_space<vmem>>, %arg4: memref<1x256xf32, #tpu.memory_space<vmem>>, %arg5: memref<1x256xf32, #tpu.memory_space<vmem>>, %arg6: memref<256x256xf32, #tpu.memory_space<vmem>>) attributes {dimension_semantics = [#tpu.dimension_semantics<parallel>], iteration_bounds = array<i64: 1>, scalar_prefetch = 1 : i64, scratch_operands = 0 : i64, tpu.core_type = #tpu.core_type<tc>, window_params = [{pipeline_mode = #tpu.pipeline_mode<synchronous>, transform_indices = @transform_0, window_bounds = array<i64: 256, 32>}, {transform_indices = @transform_1, window_bounds = array<i64: 256, 32>}, {transform_indices = @transform_2, window_bounds = array<i64: 1, 256>}, {transform_indices = @transform_3, window_bounds = array<i64: 1, 256>}, {transform_indices = @transform_4, window_bounds = array<i64: 256, 256>}]} {
    %c0 = arith.constant 0 : index
    %c0_0 = arith.constant 0 : index
    %0 = vector.load %arg2[%c0, %c0_0] : memref<256x32xf32, #tpu.memory_space<vmem>>, vector<256x32xf32>
    %c0_1 = arith.constant 0 : index
    %c0_2 = arith.constant 0 : index
    %1 = vector.load %arg3[%c0_1, %c0_2] : memref<256x32xf32, #tpu.memory_space<vmem>>, vector<256x32xf32>
    %cst = arith.constant dense<0.000000e+00> : vector<256x256xf32>
    %2 = tpu.matmul %0, %1, %cst {dimension_numbers = #tpu.dot_dimension_numbers<[1], [1], [0], [0], [0, 0, 1, 0], [], []>} : vector<256x32xf32>, vector<256x32xf32>, vector<256x256xf32> -> vector<256x256xf32>
    %3 = arith.negf %2 : vector<256x256xf32>
    %4 = math.exp %3 : vector<256x256xf32>
    %cst_3 = arith.constant 1.000000e+00 : f32
    %5 = vector.broadcast %cst_3 : f32 to vector<256x256xf32>
    %6 = arith.addf %5, %4 : vector<256x256xf32>
    %7 = arith.divf %5, %6 : vector<256x256xf32>
    %cst_4 = arith.constant dense<0.000000e+00> : vector<256xf32>
    %8 = vector.multi_reduction <add>, %7, %cst_4 [0] : vector<256x256xf32> to vector<256xf32>
    %9 = vector.shape_cast %8 : vector<256xf32> to vector<1x256xf32>
    %cst_5 = arith.constant 3.906250e-03 : f32
    %10 = vector.broadcast %cst_5 : f32 to vector<1x256xf32>
    %11 = arith.mulf %9, %10 : vector<1x256xf32>
    %12 = arith.mulf %7, %7 : vector<256x256xf32>
    %cst_6 = arith.constant dense<0.000000e+00> : vector<256xf32>
    %13 = vector.multi_reduction <add>, %12, %cst_6 [0] : vector<256x256xf32> to vector<256xf32>
    %14 = vector.shape_cast %13 : vector<256xf32> to vector<1x256xf32>
    %cst_7 = arith.constant 3.906250e-03 : f32
    %15 = vector.broadcast %cst_7 : f32 to vector<1x256xf32>
    %16 = arith.mulf %14, %15 : vector<1x256xf32>
    %17 = arith.mulf %11, %11 : vector<1x256xf32>
    %18 = arith.subf %16, %17 : vector<1x256xf32>
    %c0_8 = arith.constant 0 : index
    %c0_9 = arith.constant 0 : index
    %19 = vector.load %arg4[%c0_8, %c0_9] : memref<1x256xf32, #tpu.memory_space<vmem>>, vector<1x256xf32>
    %cst_10 = arith.constant 9.99999974E-6 : f32
    %20 = vector.broadcast %cst_10 : f32 to vector<1x256xf32>
    %21 = arith.addf %18, %20 : vector<1x256xf32>
    %22 = math.rsqrt %21 : vector<1x256xf32>
    %23 = arith.mulf %19, %22 : vector<1x256xf32>
    %c0_11 = arith.constant 0 : index
    %c0_12 = arith.constant 0 : index
    %24 = vector.load %arg5[%c0_11, %c0_12] : memref<1x256xf32, #tpu.memory_space<vmem>>, vector<1x256xf32>
    %25 = arith.mulf %11, %23 : vector<1x256xf32>
    %26 = arith.subf %24, %25 : vector<1x256xf32>
    %27 = vector.broadcast %23 : vector<1x256xf32> to vector<256x256xf32>
    %28 = arith.mulf %7, %27 : vector<256x256xf32>
    %29 = vector.broadcast %26 : vector<1x256xf32> to vector<256x256xf32>
    %30 = arith.addf %28, %29 : vector<256x256xf32>
    %c0_13 = arith.constant 0 : index
    %c0_14 = arith.constant 0 : index
    %31 = vector.load %arg6[%c0_13, %c0_14] : memref<256x256xf32, #tpu.memory_space<vmem>>, vector<256x256xf32>
    tpu.vector_store %arg6[%c0_13, %c0_14], %30 {strides = array<i32>} : memref<256x256xf32, #tpu.memory_space<vmem>>, vector<256x256xf32>,
    return
  }
  func.func @transform_0(%arg0: i32, %arg1: memref<1xi32, #tpu.memory_space<smem>>) -> (i32, i32) {
    %c0_i32 = arith.constant 0 : i32
    %c0_i32_0 = arith.constant 0 : i32
    %c0_i32_1 = arith.constant 0 : i32
    return %c0_i32, %c0_i32_0 : i32, i32
  }
  func.func @transform_1(%arg0: i32, %arg1: memref<1xi32, #tpu.memory_space<smem>>) -> (i32, i32) {
    %c0_i32 = arith.constant 0 : i32
    %c0_i32_0 = arith.constant 0 : i32
    return %arg0, %c0_i32 : i32, i32
  }
  func.func @transform_2(%arg0: i32, %arg1: memref<1xi32, #tpu.memory_space<smem>>) -> (i32, i32) {
    %c0_i32 = arith.constant 0 : i32
    %c0_i32_0 = arith.constant 0 : i32
    return %c0_i32, %arg0 : i32, i32
  }
  func.func @transform_3(%arg0: i32, %arg1: memref<1xi32, #tpu.memory_space<smem>>) -> (i32, i32) {
    %c0_i32 = arith.constant 0 : i32
    %c0_i32_0 = arith.constant 0 : i32
    return %c0_i32, %arg0 : i32, i32
  }
  func.func @transform_4(%arg0: i32, %arg1: memref<1xi32, #tpu.memory_space<smem>>) -> (i32, i32) {
    %c0_i32 = arith.constant 0 : i32
    %c0_i32_0 = arith.constant 0 : i32
    return %c0_i32, %arg0 : i32, i32
  }
}

</mosaic_0001>

<bundles_post_ra>
// kernel: tpu_custom_call.1
= control target key start
LH: loop header
LB: loop body
LE: loop exit
PB: predicated region body
PF: predicated region fallthrough
CT: control target
= control target key end

     0   :  { %vm84_vm0 = vcmask 261120   ;;  %s3189_s0 = inlined_call_operand.<no memory space> [shape: s32[1], index: 0, kind: input, shape index: {}]   ;;  %s3190_s1 = inlined_call_operand.vmem [shape: f32[256,32], index: 1, kind: input, shape index: {}]   ;;  %s3191_s2 = inlined_call_operand.vmem [shape: f32[256,32], index: 2, kind: input, shape index: {}]   ;;  %s3192_s3 = inlined_call_operand.vmem [shape: f32[1,256], index: 3, kind: input, shape index: {}]   ;;  %s3193_s4 = inlined_call_operand.vmem [shape: f32[1,256], index: 4, kind: input, shape index: {}]   ;;  %s3194_s5 = inlined_call_operand.hbm [shape: f32[256,256], index: 5, kind: output, shape index: {}]  }
   0x1   :  { %v83_v0 = vld [vmem:[%s3191_s2 + $0xf8] sm:$0xff]  ;;  %v82_v2 = vld [vmem:[%s3191_s2 + $0xf0] sm:$0xff]  ;;  %v81_v4 = vld [vmem:[%s3191_s2 + $0xe8] sm:$0xff] }
   0x2   :  { %v67_v1 = vld [vmem:[%s3191_s2 + $0x78] sm:$0xff]  ;;  %1542 = vmatprep.subr.msk.mxu0 %vm84_vm0, %v83_v0  ;;  %1638 = vmatprep.subr.msk.mxu1 %vm84_vm0, %v83_v0  ;;  %v66_v3 = vld [vmem:[%s3191_s2 + $0x70] sm:$0xff]  ;;  %v65_v5 = vld [vmem:[%s3191_s2 + $0x68] sm:$0xff] }
   0x3   :  { %1543 = vmatpush3.xpose.msk.msra.mxu0 %vm84_vm0, %v67_v1  ;;  %1654 = vmatpush3.xpose.msk.msra.mxu1 %vm84_vm0, %v67_v1  ;;  %v80_v6 = vld [vmem:[%s3191_s2 + $0xe0] sm:$0xff]  ;;  %v79_v9 = vld [vmem:[%s3191_s2 + $0xd8] sm:$0xff]  ;;  %v78_v12 = vld [vmem:[%s3191_s2 + $0xd0] sm:$0xff] }
   0x4   :  { %1544 = vmatprep.subr.msk.mxu0 %vm84_vm0, %v82_v2  ;;  %1639 = vmatprep.subr.msk.mxu1 %vm84_vm0, %v82_v2  ;;  %v2026_v7 = vld [vmem:[%s3190_s1] sm:$0xff]  ;;  %v63_v11 = vld [vmem:[%s3191_s2 + $0x58] sm:$0xff]  ;;  %v62_v13 = vld [vmem:[%s3191_s2 + $0x50] sm:$0xff] }
   0x5   :  { %v64_v8 = vld [vmem:[%s3191_s2 + $0x60] sm:$0xff]  ;;  %1574 = vmatprep.mubr.msk.f32.mxu0 %vm84_vm0, %v2026_v7  ;;  %v77_v14 = vld [vmem:[%s3191_s2 + $0xc8] sm:$0xff] }
   0x6   :  { %v2041_v10 = vld [vmem:[%s3190_s1 + $0x80] sm:$0xff] }
   0x7   :  { %1545 = vmatpush3.xpose.msk.msra.mxu0 %vm84_vm0, %v66_v3  ;;  %1655 = vmatpush3.xpose.msk.msra.mxu1 %vm84_vm0, %v66_v3 }
   0x8   :  { %1546 = vmatprep.subr.msk.mxu0 %vm84_vm0, %v81_v4  ;;  %1640 = vmatprep.subr.msk.mxu1 %vm84_vm0, %v81_v4 }
   0x9   :  { %1606 = vmatprep.mubr.msk.f32.mxu1 %vm84_vm0, %v2041_v10 }
   0xb   :  { %1547 = vmatpush3.xpose.msk.msra.mxu0 %vm84_vm0, %v65_v5  ;;  %1656 = vmatpush3.xpose.msk.msra.mxu1 %vm84_vm0, %v65_v5 }
   0xc   :  { %1548 = vmatprep.subr.msk.mxu0 %vm84_vm0, %v80_v6  ;;  %1641 = vmatprep.subr.msk.mxu1 %vm84_vm0, %v80_v6 }
   0xf   :  { %1549 = vmatpush3.xpose.msk.msra.mxu0 %vm84_vm0, %v64_v8  ;;  %1657 = vmatpush3.xpose.msk.msra.mxu1 %vm84_vm0, %v64_v8 }
  0x10   :  { %1550 = vmatprep.subr.msk.mxu0 %vm84_vm0, %v79_v9  ;;  %1642 = vmatprep.subr.msk.mxu1 %vm84_vm0, %v79_v9 }
  0x13   :  { %1551 = vmatpush3.xpose.msk.msra.mxu0 %vm84_vm0, %v63_v11  ;;  %1658 = vmatpush3.xpose.msk.msra.mxu1 %vm84_vm0, %v63_v11 }
  0x14   :  { %1552 = vmatprep.subr.msk.mxu0 %vm84_vm0, %v78_v12  ;;  %1643 = vmatprep.subr.msk.mxu1 %vm84_vm0, %v78_v12 }
  0x15   :  { %11 = vsyncpa [#allocation5], 0  ;;  %v61_v15 = vld [vmem:[%s3191_s2 + $0x48] sm:$0xff]  ;;  %v76_v16 = vld [vmem:[%s3191_s2 + $0xc0] sm:$0xff] }
  0x16   :  { %v60_v17 = vld [vmem:[%s3191_s2 + $0x40] sm:$0xff]  ;;  %v75_v18 = vld [vmem:[%s3191_s2 + $0xb8] sm:$0xff]  ;;  %v74_v20 = vld [vmem:[%s3191_s2 + $0xb0] sm:$0xff] }
  0x17   :  { %1553 = vmatpush3.xpose.msk.msra.mxu0 %vm84_vm0, %v62_v13  ;;  %1659 = vmatpush3.xpose.msk.msra.mxu1 %vm84_vm0, %v62_v13  ;;  %v59_v19 = vld [vmem:[%s3191_s2 + $0x38] sm:$0xff]  ;;  %v58_v21 = vld [vmem:[%s3191_s2 + $0x30] sm:$0xff]  ;;  %v73_v22 = vld [vmem:[%s3191_s2 + $0xa8] sm:$0xff] }
  0x18   :  { %1554 = vmatprep.subr.msk.mxu0 %vm84_vm0, %v77_v14  ;;  %1644 = vmatprep.subr.msk.mxu1 %vm84_vm0, %v77_v14  ;;  %v57_v23 = vld [vmem:[%s3191_s2 + $0x28] sm:$0xff]  ;;  %v72_v24 = vld [vmem:[%s3191_s2 + $0xa0] sm:$0xff]  ;;  %v71_v26 = vld [vmem:[%s3191_s2 + $0x98] sm:$0xff] }
  0x19   :  { %v56_v25 = vld [vmem:[%s3191_s2 + $0x20] sm:$0xff]  ;;  %v55_v27 = vld [vmem:[%s3191_s2 + $0x18] sm:$0xff]  ;;  %v70_v28 = vld [vmem:[%s3191_s2 + $0x90] sm:$0xff] }
  0x1a   :  { %v54_v29 = vld [vmem:[%s3191_s2 + $0x10] sm:$0xff]  ;;  %v69_v30 = vld [vmem:[%s3191_s2 + $0x88] sm:$0xff]  ;;  %v68_v32 = vld [vmem:[%s3191_s2 + $0x80] sm:$0xff] }
  0x1b   :  { %1555 = vmatpush3.xpose.msk.msra.mxu0 %vm84_vm0, %v61_v15  ;;  %1660 = vmatpush3.xpose.msk.msra.mxu1 %vm84_vm0, %v61_v15  ;;  %v53_v31 = vld [vmem:[%s3191_s2 + $0x8] sm:$0xff]  ;;  %v52_v33 = vld [vmem:[%s3191_s2] sm:$0xff]  ;;  %v22_v36 = vld [vmem:[%s3190_s1 + $0x10] sm:$0xff] }
  0x1c   :  { %1556 = vmatprep.subr.msk.mxu0 %vm84_vm0, %v76_v16  ;;  %1645 = vmatprep.subr.msk.mxu1 %vm84_vm0, %v76_v16  ;;  %v21_v34 = vld [vmem:[%s3190_s1 + $0x8] sm:$0xff]  ;;  %v38_v37 = vld [vmem:[%s3190_s1 + $0x90] sm:$0xff]  ;;  %v23_v38 = vld [vmem:[%s3190_s1 + $0x18] sm:$0xff] }
  0x1d   :  { %v37_v35 = vld [vmem:[%s3190_s1 + $0x88] sm:$0xff]  ;;  %v39_v39 = vld [vmem:[%s3190_s1 + $0x98] sm:$0xff]  ;;  %v24_v40 = vld [vmem:[%s3190_s1 + $0x20] sm:$0xff] }
  0x1e   :  { %v40_v41 = vld [vmem:[%s3190_s1 + $0xa0] sm:$0xff]  ;;  %v25_v42 = vld [vmem:[%s3190_s1 + $0x28] sm:$0xff]  ;;  %v26_v44 = vld [vmem:[%s3190_s1 + $0x30] sm:$0xff] }
  0x1f   :  { %1557 = vmatpush3.xpose.msk.msra.mxu0 %vm84_vm0, %v60_v17  ;;  %1661 = vmatpush3.xpose.msk.msra.mxu1 %vm84_vm0, %v60_v17  ;;  %v41_v43 = vld [vmem:[%s3190_s1 + $0xa8] sm:$0xff]  ;;  %v42_v45 = vld [vmem:[%s3190_s1 + $0xb0] sm:$0xff]  ;;  %v27_v46 = vld [vmem:[%s3190_s1 + $0x38] sm:$0xff] }
  0x20   :  { %1558 = vmatprep.subr.msk.mxu0 %vm84_vm0, %v75_v18  ;;  %1646 = vmatprep.subr.msk.mxu1 %vm84_vm0, %v75_v18  ;;  %v43_v47 = vld [vmem:[%s3190_s1 + $0xb8] sm:$0xff]  ;;  %v28_v48 = vld [vmem:[%s3190_s1 + $0x40] sm:$0xff]  ;;  %v29_v50 = vld [vmem:[%s3190_s1 + $0x48] sm:$0xff] }
  0x21   :  { %v44_v49 = vld [vmem:[%s3190_s1 + $0xc0] sm:$0xff]  ;;  %v45_v51 = vld [vmem:[%s3190_s1 + $0xc8] sm:$0xff]  ;;  %v30_v52 = vld [vmem:[%s3190_s1 + $0x50] sm:$0xff] }
  0x22   :  { %v46_v53 = vld [vmem:[%s3190_s1 + $0xd0] sm:$0xff]  ;;  %v31_v54 = vld [vmem:[%s3190_s1 + $0x58] sm:$0xff]  ;;  %v32_v56 = vld [vmem:[%s3190_s1 + $0x60] sm:$0xff] }
  0x23   :  { %1559 = vmatpush3.xpose.msk.msra.mxu0 %vm84_vm0, %v59_v19  ;;  %1662 = vmatpush3.xpose.msk.msra.mxu1 %vm84_vm0, %v59_v19  ;;  %v47_v55 = vld [vmem:[%s3190_s1 + $0xd8] sm:$0xff]  ;;  %v48_v57 = vld [vmem:[%s3190_s1 + $0xe0] sm:$0xff]  ;;  %v33_v58 = vld [vmem:[%s3190_s1 + $0x68] sm:$0xff] }
  0x24   :  { %1560 = vmatprep.subr.msk.mxu0 %vm84_vm0, %v74_v20  ;;  %1647 = vmatprep.subr.msk.mxu1 %vm84_vm0, %v74_v20  ;;  %v49_v59 = vld [vmem:[%s3190_s1 + $0xe8] sm:$0xff]  ;;  %v34_v60 = vld [vmem:[%s3190_s1 + $0x70] sm:$0xff]  ;;  %v35_v62 = vld [vmem:[%s3190_s1 + $0x78] sm:$0xff] }
  0x25   :  { %v50_v61 = vld [vmem:[%s3190_s1 + $0xf0] sm:$0xff]  ;;  %v51_v63 = vld [vmem:[%s3190_s1 + $0xf8] sm:$0xff] }
  0x27   :  { %1561 = vmatpush3.xpose.msk.msra.mxu0 %vm84_vm0, %v58_v21  ;;  %1663 = vmatpush3.xpose.msk.msra.mxu1 %vm84_vm0, %v58_v21 }
  0x28   :  { %1562 = vmatprep.subr.msk.mxu0 %vm84_vm0, %v73_v22  ;;  %1648 = vmatprep.subr.msk.mxu1 %vm84_vm0, %v73_v22 }
  0x2b   :  { %1563 = vmatpush3.xpose.msk.msra.mxu0 %vm84_vm0, %v57_v23  ;;  %1664 = vmatpush3.xpose.msk.msra.mxu1 %vm84_vm0, %v57_v23 }
  0x2c   :  { %1564 = vmatprep.subr.msk.mxu0 %vm84_vm0, %v72_v24  ;;  %1649 = vmatprep.subr.msk.mxu1 %vm84_vm0, %v72_v24 }
  0x2f   :  { %1565 = vmatpush3.xpose.msk.msra.mxu0 %vm84_vm0, %v56_v25  ;;  %1665 = vmatpush3.xpose.msk.msra.mxu1 %vm84_vm0, %v56_v25 }
  0x30   :  { %1566 = vmatprep.subr.msk.mxu0 %vm84_vm0, %v71_v26  ;;  %1650 = vmatprep.subr.msk.mxu1 %vm84_vm0, %v71_v26 }
  0x33   :  { %1567 = vmatpush3.xpose.msk.msra.mxu0 %vm84_vm0, %v55_v27  ;;  %1666 = vmatpush3.xpose.msk.msra.mxu1 %vm84_vm0, %v55_v27 }
  0x34   :  { %1568 = vmatprep.subr.msk.mxu0 %vm84_vm0, %v70_v28  ;;  %1651 = vmatprep.subr.msk.mxu1 %vm84_vm0, %v70_v28 }
  0x37   :  { %1569 = vmatpush3.xpose.msk.msra.mxu0 %vm84_vm0, %v54_v29  ;;  %1667 = vmatpush3.xpose.msk.msra.mxu1 %vm84_vm0, %v54_v29 }
  0x38   :  { %1570 = vmatprep.subr.msk.mxu0 %vm84_vm0, %v69_v30  ;;  %1652 = vmatprep.subr.msk.mxu1 %vm84_vm0, %v69_v30 }
  0x3b   :  { %1571 = vmatpush3.xpose.msk.msra.mxu0 %vm84_vm0, %v53_v31  ;;  %1668 = vmatpush3.xpose.msk.msra.mxu1 %vm84_vm0, %v53_v31 }
  0x3c   :  { %1572 = vmatprep.subr.msk.mxu0 %vm84_vm0, %v68_v32  ;;  %1653 = vmatprep.subr.msk.mxu1 %vm84_vm0, %v68_v32 }
  0x3f   :  { %1573 = vmatpush3.xpose.msk.msra.mxu0 %vm84_vm0, %v52_v33  ;;  %1669 = vmatpush3.xpose.msk.msra.mxu1 %vm84_vm0, %v52_v33 }
  0x42   :  { %1575 = vmatmul.mubr.msk.f32.vlgmr.msra.gmra.mxu0 %vm84_vm0, %v2026_v7  ;;  %1607 = vmatmul.mubr.msk.f32.vlgmr.msra.gmra.mxu1 %vm84_vm0, %v2041_v10 }
  0x43   :  { %1576 = vmatprep.mubr.msk.f32.mxu0 %vm84_vm0, %v21_v34  ;;  %1608 = vmatprep.mubr.msk.f32.mxu1 %vm84_vm0, %v37_v35 }
  0x46   :  { %1577 = vmatmul.mubr.msk.f32.gmra.mxu0 %vm84_vm0, %v21_v34  ;;  %1609 = vmatmul.mubr.msk.f32.gmra.mxu1 %vm84_vm0, %v37_v35 }
  0x47   :  { %1578 = vmatprep.mubr.msk.f32.mxu0 %vm84_vm0, %v22_v36  ;;  %1610 = vmatprep.mubr.msk.f32.mxu1 %vm84_vm0, %v38_v37 }
  0x4a   :  { %1579 = vmatmul.mubr.msk.f32.gmra.mxu0 %vm84_vm0, %v22_v36  ;;  %1611 = vmatmul.mubr.msk.f32.gmra.mxu1 %vm84_vm0, %v38_v37 }
  0x4b   :  { %1580 = vmatprep.mubr.msk.f32.mxu0 %vm84_vm0, %v23_v38  ;;  %1612 = vmatprep.mubr.msk.f32.mxu1 %vm84_vm0, %v39_v39 }
  0x4e   :  { %1581 = vmatmul.mubr.msk.f32.gmra.mxu0 %vm84_vm0, %v23_v38  ;;  %1613 = vmatmul.mubr.msk.f32.gmra.mxu1 %vm84_vm0, %v39_v39 }
  0x4f   :  { %1582 = vmatprep.mubr.msk.f32.mxu0 %vm84_vm0, %v24_v40  ;;  %1614 = vmatprep.mubr.msk.f32.mxu1 %vm84_vm0, %v40_v41 }
  0x52   :  { %1583 = vmatmul.mubr.msk.f32.gmra.mxu0 %vm84_vm0, %v24_v40  ;;  %1615 = vmatmul.mubr.msk.f32.gmra.mxu1 %vm84_vm0, %v40_v41 }
  0x53   :  { %1584 = vmatprep.mubr.msk.f32.mxu0 %vm84_vm0, %v25_v42  ;;  %1616 = vmatprep.mubr.msk.f32.mxu1 %vm84_vm0, %v41_v43 }
  0x56   :  { %1585 = vmatmul.mubr.msk.f32.gmra.mxu0 %vm84_vm0, %v25_v42  ;;  %1617 = vmatmul.mubr.msk.f32.gmra.mxu1 %vm84_vm0, %v41_v43 }
  0x57   :  { %1586 = vmatprep.mubr.msk.f32.mxu0 %vm84_vm0, %v26_v44  ;;  %1618 = vmatprep.mubr.msk.f32.mxu1 %vm84_vm0, %v42_v45 }
  0x5a   :  { %1587 = vmatmul.mubr.msk.f32.gmra.mxu0 %vm84_vm0, %v26_v44  ;;  %1619 = vmatmul.mubr.msk.f32.gmra.mxu1 %vm84_vm0, %v42_v45 }
  0x5b   :  { %1588 = vmatprep.mubr.msk.f32.mxu0 %vm84_vm0, %v27_v46  ;;  %1620 = vmatprep.mubr.msk.f32.mxu1 %vm84_vm0, %v43_v47 }
  0x5e   :  { %1589 = vmatmul.mubr.msk.f32.gmra.mxu0 %vm84_vm0, %v27_v46  ;;  %1621 = vmatmul.mubr.msk.f32.gmra.mxu1 %vm84_vm0, %v43_v47 }
  0x5f   :  { %1590 = vmatprep.mubr.msk.f32.mxu0 %vm84_vm0, %v28_v48  ;;  %1622 = vmatprep.mubr.msk.f32.mxu1 %vm84_vm0, %v44_v49 }
  0x62   :  { %1591 = vmatmul.mubr.msk.f32.gmra.mxu0 %vm84_vm0, %v28_v48  ;;  %1623 = vmatmul.mubr.msk.f32.gmra.mxu1 %vm84_vm0, %v44_v49 }
  0x63   :  { %1592 = vmatprep.mubr.msk.f32.mxu0 %vm84_vm0, %v29_v50  ;;  %1624 = vmatprep.mubr.msk.f32.mxu1 %vm84_vm0, %v45_v51 }
  0x66   :  { %1593 = vmatmul.mubr.msk.f32.gmra.mxu0 %vm84_vm0, %v29_v50  ;;  %1625 = vmatmul.mubr.msk.f32.gmra.mxu1 %vm84_vm0, %v45_v51 }
  0x67   :  { %1594 = vmatprep.mubr.msk.f32.mxu0 %vm84_vm0, %v30_v52  ;;  %1626 = vmatprep.mubr.msk.f32.mxu1 %vm84_vm0, %v46_v53 }
  0x6a   :  { %1595 = vmatmul.mubr.msk.f32.gmra.mxu0 %vm84_vm0, %v30_v52  ;;  %1627 = vmatmul.mubr.msk.f32.gmra.mxu1 %vm84_vm0, %v46_v53 }
  0x6b   :  { %1596 = vmatprep.mubr.msk.f32.mxu0 %vm84_vm0, %v31_v54  ;;  %1628 = vmatprep.mubr.msk.f32.mxu1 %vm84_vm0, %v47_v55 }
  0x6e   :  { %1597 = vmatmul.mubr.msk.f32.gmra.mxu0 %vm84_vm0, %v31_v54  ;;  %1629 = vmatmul.mubr.msk.f32.gmra.mxu1 %vm84_vm0, %v47_v55 }
  0x6f   :  { %1598 = vmatprep.mubr.msk.f32.mxu0 %vm84_vm0, %v32_v56  ;;  %1630 = vmatprep.mubr.msk.f32.mxu1 %vm84_vm0, %v48_v57 }
  0x72   :  { %1599 = vmatmul.mubr.msk.f32.gmra.mxu0 %vm84_vm0, %v32_v56  ;;  %1631 = vmatmul.mubr.msk.f32.gmra.mxu1 %vm84_vm0, %v48_v57 }
  0x73   :  { %1600 = vmatprep.mubr.msk.f32.mxu0 %vm84_vm0, %v33_v58  ;;  %1632 = vmatprep.mubr.msk.f32.mxu1 %vm84_vm0, %v49_v59 }
  0x76   :  { %1601 = vmatmul.mubr.msk.f32.gmra.mxu0 %vm84_vm0, %v33_v58  ;;  %1633 = vmatmul.mubr.msk.f32.gmra.mxu1 %vm84_vm0, %v49_v59 }
  0x77   :  { %1602 = vmatprep.mubr.msk.f32.mxu0 %vm84_vm0, %v34_v60  ;;  %1634 = vmatprep.mubr.msk.f32.mxu1 %vm84_vm0, %v50_v61 }
  0x7a   :  { %1603 = vmatmul.mubr.msk.f32.gmra.mxu0 %vm84_vm0, %v34_v60  ;;  %1635 = vmatmul.mubr.msk.f32.gmra.mxu1 %vm84_vm0, %v50_v61 }
  0x7b   :  { %1604 = vmatprep.mubr.msk.f32.mxu0 %vm84_vm0, %v35_v62  ;;  %1636 = vmatprep.mubr.msk.f32.mxu1 %vm84_vm0, %v51_v63 }
  0x7e   :  { %1605 = vmatmul.mubr.msk.f32.gmra.mxu0 %vm84_vm0, %v35_v62  ;;  %1637 = vmatmul.mubr.msk.f32.gmra.mxu1 %vm84_vm0, %v51_v63 }
 0x102   :  { %v343_v0 = vpop.f32.mrf.mxu0  ;;  %v439_v1 = vpop.f32.mrf.mxu1 }
 0x103   :  { %v1478_v4 = vmul.f32 -1.442695, %v343_v0  ;;  %v1510_v7 = vmul.f32 -1.442695, %v439_v1 }
 0x104   :  { %v345_v2 = vpop.f32.mrf.mxu0  ;;  %v441_v3 = vpop.f32.mrf.mxu1 }
 0x105   :  { %v1479_v8 = vmul.f32 -1.442695, %v345_v2  ;;  %v1511_v11 = vmul.f32 -1.442695, %v441_v3  ;;  %1674 = vpow2.f32 %v1478_v4 }
 0x106   :  { %v349_v5 = vpop.f32.mrf.mxu0  ;;  %v445_v6 = vpop.f32.mrf.mxu1  ;;  %1676 = vpow2.f32 %v1510_v7 }
 0x107   :  { %v1480_v12 = vmul.f32 -1.442695, %v349_v5  ;;  %v1512_v15 = vmul.f32 -1.442695, %v445_v6  ;;  %1678 = vpow2.f32 %v1479_v8 }
 0x108   :  { %v351_v9 = vpop.f32.mrf.mxu0  ;;  %v447_v10 = vpop.f32.mrf.mxu1  ;;  %1680 = vpow2.f32 %v1511_v11 }
 0x109   :  { %v1481_v16 = vmul.f32 -1.442695, %v351_v9  ;;  %v1513_v19 = vmul.f32 -1.442695, %v447_v10  ;;  %1682 = vpow2.f32 %v1480_v12 }
 0x10a   :  { %v355_v13 = vpop.f32.mrf.mxu0  ;;  %v451_v14 = vpop.f32.mrf.mxu1  ;;  %1684 = vpow2.f32 %v1512_v15 }
 0x10b   :  { %v1482_v20 = vmul.f32 -1.442695, %v355_v13  ;;  %1686 = vpow2.f32 %v1481_v16  ;;  %v1514_v27 = vmul.f32 -1.442695, %v451_v14 }
 0x10c   :  { %v357_v17 = vpop.f32.mrf.mxu0  ;;  %v453_v18 = vpop.f32.mrf.mxu1  ;;  %1688 = vpow2.f32 %v1513_v19 }
 0x10d   :  { %v1483_v23 = vmul.f32 -1.442695, %v357_v17  ;;  %1690 = vpow2.f32 %v1482_v20  ;;  %v1515_v31 = vmul.f32 -1.442695, %v453_v18 }
 0x10e   :  { %v361_v21 = vpop.f32.mrf.mxu0  ;;  %v457_v22 = vpop.f32.mrf.mxu1 }
 0x10f   :  { %v1484_v24 = vmul.f32 -1.442695, %v361_v21  ;;  %1692 = vpow2.f32 %v1483_v23  ;;  %v1516_v37 = vmul.f32 -1.442695, %v457_v22 }
 0x110   :  { %v363_v25 = vpop.f32.mrf.mxu0  ;;  %v459_v26 = vpop.f32.mrf.mxu1 }
 0x111   :  { %v1485_v28 = vmul.f32 -1.442695, %v363_v25  ;;  %1694 = vpow2.f32 %v1484_v24  ;;  %v1517_v43 = vmul.f32 -1.442695, %v459_v26 }
 0x112   :  { %v367_v29 = vpop.f32.mrf.mxu0  ;;  %v2318_v30 = vpop.f32.mrf.mxu1  ;;  %1696 = vpow2.f32 %v1514_v27 }
 0x113   :  { %v1486_v32 = vmul.f32 -1.442695, %v367_v29  ;;  %1698 = vpow2.f32 %v1485_v28  ;;  %v1675_v39 = vpop.eup %1674 }
 0x114   :  { %v369_v33 = vpop.f32.mrf.mxu0  ;;  %v2320_v34 = vpop.f32.mrf.mxu1  ;;  %1700 = vpow2.f32 %v1515_v31  ;;  %v726_v48 = vadd.f32 1.0, %v1675_v39 }
 0x115   :  { %v1487_v35 = vmul.f32 -1.442695, %v369_v33  ;;  %v1677_v41 = vpop.eup %1676  ;;  %1702 = vpow2.f32 %v1486_v32 }
 0x116   :  { %v373_v36 = vpop.f32.mrf.mxu0  ;;  %v2322_v38 = vpop.f32.mrf.mxu1  ;;  %v758_v21 = vadd.f32 1.0, %v1677_v41 }
 0x117   :  { %v1488_v40 = vmul.f32 -1.442695, %v373_v36  ;;  %v1679_v45 = vpop.eup %1678  ;;  %1704 = vpow2.f32 %v1487_v35 }
 0x118   :  { %v375_v42 = vpop.f32.mrf.mxu0  ;;  %v2324_v44 = vpop.f32.mrf.mxu1  ;;  %1706 = vpow2.f32 %v1516_v37  ;;  %v727_v54 = vadd.f32 1.0, %v1679_v45 }
 0x119   :  { %v1489_v46 = vmul.f32 -1.442695, %v375_v42  ;;  %v1681_v47 = vpop.eup %1680  ;;  %1708 = vpow2.f32 %v1488_v40 }
 0x11a   :  { %v379_v49 = vpop.f32.mrf.mxu0  ;;  %v2326_v50 = vpop.f32.mrf.mxu1  ;;  %1710 = vpow2.f32 %v1517_v43  ;;  %v759_v29 = vadd.f32 1.0, %v1681_v47 }
 0x11b   :  { %v1683_v51 = vpop.eup %1682  ;;  %v1490_v52 = vmul.f32 -1.442695, %v379_v49  ;;  %1712 = vpow2.f32 %v1489_v46 }
 0x11c   :  { %v2328_v53 = vpop.eup %1684  ;;  %v381_v55 = vpop.f32.mrf.mxu0  ;;  %1714 = vrcp.f32 %v726_v48  ;;  %v728_v60 = vadd.f32 1.0, %v1683_v51 }
 0x11d   :  { %v2330_v56 = vpop.f32.mrf.mxu1  ;;  %v1687_v57 = vpop.eup %1686  ;;  %v1491_v58 = vmul.f32 -1.442695, %v381_v55  ;;  %1716 = vpow2.f32 %v1490_v52  ;;  %v760_v43 = vadd.f32 1.0, %v2328_v53 }
 0x11e   :  { %v2332_v59 = vpop.eup %1688  ;;  %v385_v61 = vpop.f32.mrf.mxu0  ;;  %1718 = vrcp.f32 %v727_v54  ;;  %v729_v2 = vadd.f32 1.0, %v1687_v57 }
 0x11f   :  { %v1691_v62 = vpop.eup %1690  ;;  %v1492_v63 = vmul.f32 -1.442695, %v385_v61  ;;  %v2334_v0 = vpop.f32.mrf.mxu1  ;;  %1720 = vpow2.f32 %v1491_v58  ;;  %v761_v57 = vadd.f32 1.0, %v2332_v59 }
 0x120   :  { %v1693_v1 = vpop.eup %1692  ;;  %v387_v3 = vpop.f32.mrf.mxu0  ;;  %1722 = vrcp.f32 %v728_v60  ;;  %v730_v7 = vadd.f32 1.0, %v1691_v62 }
 0x121   :  { %v1695_v4 = vpop.eup %1694  ;;  %v1493_v5 = vmul.f32 -1.442695, %v387_v3  ;;  %v731_v10 = vadd.f32 1.0, %v1693_v1  ;;  %1724 = vpow2.f32 %v1492_v63  ;;  %v2338_v11 = vpop.f32.mrf.mxu1 }
 0x122   :  { %v2336_v6 = vpop.eup %1696  ;;  %v391_v8 = vpop.f32.mrf.mxu0  ;;  %1726 = vrcp.f32 %v729_v2  ;;  %v732_v13 = vadd.f32 1.0, %v1695_v4 }
 0x123   :  { %v1699_v9 = vpop.eup %1698  ;;  %1728 = vpow2.f32 %v1493_v5  ;;  %v1494_v16 = vmul.f32 -1.442695, %v391_v8  ;;  %v2344_v22 = vpop.f32.mrf.mxu1  ;;  %v762_v4 = vadd.f32 1.0, %v2336_v6 }
 0x124   :  { %v2340_v12 = vpop.eup %1700  ;;  %v393_v14 = vpop.f32.mrf.mxu0  ;;  %1730 = vrcp.f32 %v730_v7  ;;  %v733_v18 = vadd.f32 1.0, %v1699_v9 }
 0x125   :  { %v1703_v15 = vpop.eup %1702  ;;  %1732 = vrcp.f32 %v731_v10  ;;  %v2350_v35 = vpop.f32.mrf.mxu1  ;;  %v1495_v37 = vmul.f32 -1.442695, %v393_v14 }
 0x126   :  { %v1705_v17 = vpop.eup %1704  ;;  %v397_v19 = vpop.f32.mrf.mxu0  ;;  %1734 = vrcp.f32 %v732_v13  ;;  %v734_v24 = vadd.f32 1.0, %v1703_v15 }
 0x127   :  { %v2342_v20 = vpop.eup %1706  ;;  %v735_v27 = vadd.f32 1.0, %v1705_v17  ;;  %1736 = vpow2.f32 %v1494_v16  ;;  %v2357_v48 = vpop.f32.mrf.mxu1  ;;  %v1496_v51 = vmul.f32 -1.442695, %v397_v19  ;;  %v763_v17 = vadd.f32 1.0, %v2340_v12 }
 0x128   :  { %v1709_v23 = vpop.eup %1708  ;;  %v399_v25 = vpop.f32.mrf.mxu0  ;;  %1738 = vrcp.f32 %v733_v18 }
 0x129   :  { %v2346_v26 = vpop.eup %1710  ;;  %v736_v33 = vadd.f32 1.0, %v1709_v23  ;;  %1740 = vrcp.f32 %v758_v21  ;;  %v2364_v61 = vpop.f32.mrf.mxu1  ;;  %v1497_v63 = vmul.f32 -1.442695, %v399_v25  ;;  %v764_v25 = vadd.f32 1.0, %v2342_v20 }
 0x12a   :  { %v1713_v28 = vpop.eup %1712  ;;  %v403_v31 = vpop.f32.mrf.mxu0  ;;  %1742 = vrcp.f32 %v734_v24 }
 0x12b   :  { %v2348_v32 = vpop.eup %1714  ;;  %1744 = vrcp.f32 %v735_v27  ;;  %v737_v41 = vadd.f32 1.0, %v1713_v28  ;;  %v1498_v5 = vmul.f32 -1.442695, %v403_v31  ;;  %v2373_v8 = vpop.f32.mrf.mxu1  ;;  %v1518_v28 = vmul.f32 -1.442695, %v2318_v30 }
 0x12c   :  { %v1717_v36 = vpop.eup %1716  ;;  %v405_v39 = vpop.f32.mrf.mxu0  ;;  %1746 = vrcp.f32 %v759_v29 }
 0x12d   :  { %v2352_v40 = vpop.eup %1718  ;;  %1748 = vrcp.f32 %v736_v33  ;;  %v738_v46 = vadd.f32 1.0, %v1717_v36  ;;  %v1499_v10 = vmul.f32 -1.442695, %v405_v39  ;;  %v2384_v19 = vpop.f32.mrf.mxu1 }
 0x12e   :  { %v1721_v42 = vpop.eup %1720  ;;  %v409_v47 = vpop.f32.mrf.mxu0  ;;  %1750 = vpow2.f32 %v1495_v37  ;;  %v1519_v37 = vmul.f32 -1.442695, %v2320_v34 }
 0x12f   :  { %v2355_v45 = vpop.eup %1722  ;;  %1752 = vrcp.f32 %v737_v41  ;;  %v739_v54 = vadd.f32 1.0, %v1721_v42  ;;  %v1500_v16 = vmul.f32 -1.442695, %v409_v47  ;;  %v2394_v33 = vpop.f32.mrf.mxu1 }
 0x130   :  { %v1725_v49 = vpop.eup %1724  ;;  %1754 = vrcp.f32 %v760_v43  ;;  %v411_v60 = vpop.f32.mrf.mxu0  ;;  %v1520_v43 = vmul.f32 -1.442695, %v2322_v38  ;;  %v1521_v38 = vmul.f32 -1.442695, %v2324_v44  ;;  %v1523_v44 = vmul.f32 -1.442695, %v2330_v56 }
 0x131   :  { %v2359_v52 = vpop.eup %1726  ;;  %1756 = vrcp.f32 %v738_v46  ;;  %v740_v53 = vadd.f32 1.0, %v1725_v49  ;;  %v1501_v23 = vmul.f32 -1.442695, %v411_v60  ;;  %v2404_v47 = vpop.f32.mrf.mxu1  ;;  %v994_v56 = vmul.f32 %v2348_v32, %v2348_v32 }
 0x132   :  { %v1729_v55 = vpop.eup %1728  ;;  %1758 = vpow2.f32 %v1496_v51  ;;  %v415_v7 = vpop.f32.mrf.mxu0  ;;  %v765_v51 = vadd.f32 1.0, %v2346_v26 }
 0x133   :  { %v2362_v58 = vpop.eup %1730  ;;  %1760 = vrcp.f32 %v739_v54  ;;  %v741_v2 = vadd.f32 1.0, %v1729_v55  ;;  %v1502_v12 = vmul.f32 -1.442695, %v415_v7  ;;  %v1522_v7 = vmul.f32 -1.442695, %v2326_v50 }
 0x134   :  { %v2366_v62 = vpop.eup %1732  ;;  %1762 = vrcp.f32 %v761_v57  ;;  %v417_v18 = vpop.f32.mrf.mxu0  ;;  %v2430_v50 = vmul.f32 -1.442695, %v2338_v11  ;;  %v2444_v11 = vmul.f32 -1.442695, %v2350_v35 }
 0x135   :  { %3222 = vst [vmem:[#allocation7_spill] sm:$0xff] %v2366_v62  ;;  %v2368_v1 = vpop.eup %1734  ;;  %1764 = vrcp.f32 %v740_v53  ;;  %v1503_v42 = vmul.f32 -1.442695, %v417_v18 }
 0x136   :  { %3223 = vst [vmem:[#allocation8_spill] sm:$0xff] %v2368_v1  ;;  %v1737_v3 = vpop.eup %1736  ;;  %1766 = vpow2.f32 %v1497_v63  ;;  %v421_v31 = vpop.f32.mrf.mxu0 }
 0x137   :  { %v2371_v59 = vpop.eup %1738  ;;  %1768 = vrcp.f32 %v741_v2  ;;  %v742_v14 = vadd.f32 1.0, %v1737_v3  ;;  %v1504_v54 = vmul.f32 -1.442695, %v421_v31  ;;  %v2414_v63 = vpop.f32.mrf.mxu1  ;;  %v2437_v31 = vmul.f32 -1.442695, %v2344_v22 }
 0x138   :  { %3224 = vst [vmem:[#allocation9_spill] sm:$0xff] %v2371_v59  ;;  %v2375_v9 = vpop.eup %1740  ;;  %1770 = vrcp.f32 %v762_v4  ;;  %v423_v46 = vpop.f32.mrf.mxu0 }
 0x139   :  { %v2377_v13 = vpop.eup %1742  ;;  %1772 = vpow2.f32 %v1498_v5  ;;  %v1505_v3 = vmul.f32 -1.442695, %v423_v46  ;;  %v2423_v18 = vpop.f32.mrf.mxu1 }
 0x13a   :  { %3225 = vst [vmem:[#allocation10_spill] sm:$0xff] %v2377_v13  ;;  %v2379_v15 = vpop.eup %1744  ;;  %1774 = vpow2.f32 %v1499_v10  ;;  %v427_v60 = vpop.f32.mrf.mxu0 }
 0x13b   :  { %3226 = vst [vmem:[#allocation11_spill] sm:$0xff] %v2379_v15  ;;  %v2381_v6 = vpop.eup %1746  ;;  %1776 = vrcp.f32 %v742_v14  ;;  %v1506_v10 = vmul.f32 -1.442695, %v427_v60  ;;  %v2451_v22 = vpop.f32.mrf.mxu1  ;;  %v955_v60 = vadd.f32 %v2359_v52, %v2352_v40 }
 0x13c   :  { %v2386_v21 = vpop.eup %1748  ;;  %1778 = vpow2.f32 %v1500_v16 }
 0x13d   :  { %3227 = vst [vmem:[#allocation12_spill] sm:$0xff] %v2386_v21  ;;  %v1751_v24 = vpop.eup %1750  ;;  %1780 = vrcp.f32 %v763_v17  ;;  %v2421_v17 = vmul.f32 -1.442695, %v2334_v0  ;;  %v997_v0 = vmul.f32 %v2359_v52, %v2359_v52 }
 0x13e   :  { %v2389_v27 = vpop.eup %1752  ;;  %1782 = vpow2.f32 %v1501_v23  ;;  %v743_v41 = vadd.f32 1.0, %v1751_v24  ;;  %v996_v24 = vmul.f32 %v2355_v45, %v2355_v45 }
 0x13f   :  { %3228 = vst [vmem:[#allocation13_spill] sm:$0xff] %v2389_v27  ;;  %v2392_v29 = vpop.eup %1754  ;;  %1784 = vrcp.f32 %v764_v25 }
 0x140   :  { %v2396_v36 = vpop.eup %1756  ;;  %1786 = vpow2.f32 %v1518_v28  ;;  %v429_v28 = vpop.f32.mrf.mxu0 }
 0x141   :  { %3229 = vst [vmem:[#allocation14_spill] sm:$0xff] %v2396_v36  ;;  %v1759_v39 = vpop.eup %1758  ;;  %1788 = vpow2.f32 %v1502_v12  ;;  %v1507_v46 = vmul.f32 -1.442695, %v429_v28 }
 0x142   :  { %v2399_v20 = vpop.eup %1760  ;;  %1790 = vpow2.f32 %v1519_v37  ;;  %v744_v57 = vadd.f32 1.0, %v1759_v39  ;;  %v995_v39 = vmul.f32 %v2352_v40, %v2352_v40 }
 0x143   :  { %3230 = vst [vmem:[#allocation15_spill] sm:$0xff] %v2399_v20  ;;  %v2401_v30 = vpop.eup %1762  ;;  %1792 = vrcp.f32 %v743_v41 }
 0x144   :  { %v2406_v49 = vpop.eup %1764  ;;  %1794 = vpow2.f32 %v1503_v42 }
 0x145   :  { %v1767_v34 = vpop.eup %1766  ;;  %1796 = vpow2.f32 %v1520_v43  ;;  %v918_v43 = vadd.f32 %v2355_v45, %v2348_v32 }
 0x146   :  { %v2409_v55 = vpop.eup %1768  ;;  %1798 = vrcp.f32 %v765_v51  ;;  %v745_v4 = vadd.f32 1.0, %v1767_v34  ;;  %v2449_v51 = vmul.f32 -1.442695, %v2357_v48 }
 0x147   :  { %v2411_v53 = vpop.eup %1770  ;;  %1800 = vpow2.f32 %v1504_v54  ;;  %v1058_v54 = vadd.f32 %v996_v24, %v994_v56  ;;  %v1000_v24 = vmul.f32 %v2368_v1, %v2368_v1  ;;  %v956_v56 = vadd.f32 %v2366_v62, %v955_v60 }
 0x148   :  { %v1773_v2 = vpop.eup %1772  ;;  %1802 = vrcp.f32 %v744_v57  ;;  %v998_v57 = vmul.f32 %v2362_v58, %v2362_v58 }
 0x149   :  { %v1775_v26 = vpop.eup %1774  ;;  %v746_v16 = vadd.f32 1.0, %v1773_v2  ;;  %1804 = vpow2.f32 %v1521_v38  ;;  %v1095_v2 = vadd.f32 %v997_v0, %v995_v39 }
 0x14a   :  { %v2416_v5 = vpop.eup %1776  ;;  %v747_v25 = vadd.f32 1.0, %v1775_v26  ;;  %1806 = vpow2.f32 %v1505_v3  ;;  %v2458_v3 = vmul.f32 -1.442695, %v2364_v61  ;;  %v919_v26 = vadd.f32 %v2362_v58, %v918_v43  ;;  %v519_v61 = vpop.f32.mrf.mxu1 }
 0x14b   :  { %v1779_v14 = vpop.eup %1778  ;;  %1808 = vrcp.f32 %v745_v4  ;;  %v999_v4 = vmul.f32 %v2366_v62, %v2366_v62  ;;  %v2476_v43 = vmul.f32 -1.442695, %v2384_v19  ;;  %v2482_v62 = vmul.f32 -1.442695, %v2394_v33 }
 0x14c   :  { %v2425_v23 = vpop.eup %1780  ;;  %v748_v41 = vadd.f32 1.0, %v1779_v14  ;;  %1810 = vpow2.f32 %v1506_v10  ;;  %v433_v14 = vpop.f32.mrf.mxu0  ;;  %v957_v19 = vadd.f32 %v2371_v59, %v956_v56 }
 0x14d   :  { %v1783_v12 = vpop.eup %1782  ;;  %1812 = vrcp.f32 %v746_v16 }
 0x14e   :  { %v2439_v37 = vpop.eup %1784  ;;  %1814 = vrcp.f32 %v747_v25  ;;  %v749_v38 = vadd.f32 1.0, %v1783_v12  ;;  %v1059_v12 = vadd.f32 %v1058_v54, %v998_v57  ;;  %v435_v60 = vpop.f32.mrf.mxu0 }
 0x14f   :  { %v1787_v42 = vpop.eup %1786  ;;  %1816 = vpow2.f32 %v1522_v7  ;;  %v2468_v7 = vmul.f32 -1.442695, %v2373_v8  ;;  %v1096_v8 = vadd.f32 %v1095_v2, %v999_v4  ;;  %v1002_v2 = vmul.f32 %v2377_v13, %v2377_v13 }
 0x150   :  { %v1789_v34 = vpop.eup %1788  ;;  %1818 = vrcp.f32 %v748_v41  ;;  %v766_v10 = vadd.f32 1.0, %v1787_v42  ;;  %v1001_v41 = vmul.f32 %v2371_v59, %v2371_v59  ;;  %v1508_v42 = vmul.f32 -1.442695, %v433_v14 }
 0x151   :  { %v1791_v35 = vpop.eup %1790  ;;  %v750_v25 = vadd.f32 1.0, %v1789_v34  ;;  %1820 = vpow2.f32 %v1507_v46  ;;  %v920_v34 = vadd.f32 %v2368_v1, %v919_v26  ;;  %v2488_v26 = vmul.f32 -1.442695, %v2404_v47 }
 0x152   :  { %v2460_v48 = vpop.eup %1792  ;;  %1822 = vrcp.f32 %v749_v38  ;;  %v767_v0 = vadd.f32 1.0, %v1791_v35  ;;  %v1060_v38 = vadd.f32 %v1059_v12, %v1000_v24  ;;  %v1509_v12 = vmul.f32 -1.442695, %v435_v60 }
 0x153   :  { %v1795_v16 = vpop.eup %1794  ;;  %1824 = vpow2.f32 %v1523_v44  ;;  %v523_v44 = vpop.f32.mrf.mxu1 }
 0x154   :  { %v1797_v28 = vpop.eup %1796  ;;  %1826 = vrcp.f32 %v766_v10  ;;  %v751_v54 = vadd.f32 1.0, %v1795_v16  ;;  %v1097_v10 = vadd.f32 %v1096_v8, %v1001_v41  ;;  %v2492_v16 = vmul.f32 %v2375_v9, %v2375_v9 }
 0x155   :  { %v2471_v39 = vpop.eup %1798  ;;  %1828 = vrcp.f32 %v750_v25  ;;  %v768_v35 = vadd.f32 1.0, %v1797_v28  ;;  %v921_v25 = vadd.f32 %v2377_v13, %v920_v34  ;;  %v1003_v28 = vmul.f32 %v2379_v15, %v2379_v15 }
 0x156   :  { %v1801_v46 = vpop.eup %1800  ;;  %1830 = vrcp.f32 %v767_v0  ;;  %v2500_v0 = vmul.f32 -1.442695, %v2414_v63  ;;  %v2503_v41 = vmul.f32 -1.442695, %v2423_v18  ;;  %v1061_v8 = vadd.f32 %v1060_v38, %v1002_v2 }
 0x157   :  { %v2479_v57 = vpop.eup %1802  ;;  %v752_v24 = vadd.f32 1.0, %v1801_v46  ;;  %1832 = vpow2.f32 %v1508_v42  ;;  %v525_v46 = vpop.f32.mrf.mxu1  ;;  %v1004_v34 = vmul.f32 %v2386_v21, %v2386_v21  ;;  %v1005_v63 = vmul.f32 %v2389_v27, %v2389_v27 }
 0x158   :  { %3231 = vst [vmem:[#allocation16_spill] sm:$0xff] %v2479_v57  ;;  %v1805_v14 = vpop.eup %1804  ;;  %1834 = vrcp.f32 %v751_v54  ;;  %v2517_v18 = vmul.f32 %v2381_v6, %v2381_v6  ;;  %v1098_v38 = vadd.f32 %v1097_v10, %v1003_v28  ;;  %v2522_v2 = vmul.f32 -1.442695, %v2451_v22 }
 0x159   :  { %v1807_v4 = vpop.eup %1806  ;;  %1836 = vrcp.f32 %v768_v35  ;;  %v769_v47 = vadd.f32 1.0, %v1805_v14  ;;  %v958_v35 = vadd.f32 %v2379_v15, %v957_v19  ;;  %v922_v19 = vadd.f32 %v2386_v21, %v921_v25  ;;  %v529_v59 = vpop.f32.mrf.mxu1 }
 0x15a   :  { %v2494_v33 = vpop.eup %1808  ;;  %v753_v13 = vadd.f32 1.0, %v1807_v4  ;;  %1838 = vpow2.f32 %v2421_v17  ;;  %v1006_v4 = vmul.f32 %v2396_v36, %v2396_v36  ;;  %v2529_v15 = vmul.f32 -1.442695, %v519_v61 }
 0x15b   :  { %3232 = vst [vmem:[#allocation17_spill] sm:$0xff] %v2494_v33  ;;  %v1811_v56 = vpop.eup %1810  ;;  %1840 = vrcp.f32 %v752_v24  ;;  %v1062_v1 = vadd.f32 %v1061_v8, %v1004_v34  ;;  %v959_v10 = vadd.f32 %v2389_v27, %v958_v35  ;;  %v2534_v28 = vmul.f32 %v2392_v29, %v2392_v29 }
 0x15c   :  { %v2505_v42 = vpop.eup %1812  ;;  %v754_v14 = vadd.f32 1.0, %v1811_v56  ;;  %1842 = vpow2.f32 %v1509_v12  ;;  %v1099_v12 = vadd.f32 %v1098_v38, %v1005_v63  ;;  %v1007_v25 = vmul.f32 %v2399_v20, %v2399_v20 }
 0x15d   :  { %v2510_v54 = vpop.eup %1814  ;;  %1844 = vrcp.f32 %v769_v47  ;;  %v2541_v61 = vmul.f32 -1.442695, %v523_v44  ;;  %v923_v47 = vadd.f32 %v2396_v36, %v922_v19  ;;  %v1008_v8 = vmul.f32 %v2406_v49, %v2406_v49 }
 0x15e   :  { %v2519_v60 = vpop.eup %1816  ;;  %1846 = vrcp.f32 %v753_v13  ;;  %v1063_v35 = vadd.f32 %v1062_v1, %v1006_v4  ;;  %v960_v63 = vadd.f32 %v2399_v20, %v959_v10  ;;  %v2552_v38 = vmul.f32 -1.442695, %v525_v46 }
 0x15f   :  { %v2524_v17 = vpop.eup %1818  ;;  %1848 = vpow2.f32 %v2430_v50  ;;  %v531_v50 = vpop.f32.mrf.mxu1  ;;  %v1009_v19 = vmul.f32 %v2409_v55, %v2409_v55  ;;  %v1010_v36 = vmul.f32 %v2416_v5, %v2416_v5  ;;  %v924_v46 = vadd.f32 %v2406_v49, %v923_v47 }
 0x160   :  { %v1821_v24 = vpop.eup %1820  ;;  %1850 = vrcp.f32 %v754_v14  ;;  %v2562_v14 = vmul.f32 %v2401_v30, %v2401_v30  ;;  %v2569_v4 = vmul.f32 -1.442695, %v529_v59  ;;  %v1064_v10 = vadd.f32 %v1063_v35, %v1008_v8 }
 0x161   :  { %v2536_v22 = vpop.eup %1822  ;;  %v755_v34 = vadd.f32 1.0, %v1821_v24  ;;  %1852 = vpow2.f32 %v2437_v31  ;;  %v1100_v31 = vadd.f32 %v1099_v12, %v1007_v25  ;;  %v1011_v20 = vmul.f32 %v2460_v48, %v2460_v48 }
 0x162   :  { %v2543_v56 = vpop.eup %1824  ;;  %1854 = vpow2.f32 %v2444_v11  ;;  %v2573_v27 = vmul.f32 -1.442695, %v531_v50  ;;  %v961_v11 = vadd.f32 %v2409_v55, %v960_v63  ;;  %v1012_v12 = vmul.f32 %v2479_v57, %v2479_v57 }
 0x163   :  { %v2548_v13 = vpop.eup %1826  ;;  %1856 = vpow2.f32 %v2449_v51  ;;  %v1101_v51 = vadd.f32 %v1100_v31, %v1009_v19  ;;  %v925_v47 = vadd.f32 %v2416_v5, %v924_v46  ;;  %v1065_v8 = vadd.f32 %v1064_v10, %v1010_v36 }
 0x164   :  { %v2554_v44 = vpop.eup %1828  ;;  %1858 = vrcp.f32 %v755_v34  ;;  %v962_v35 = vadd.f32 %v2460_v48, %v961_v11  ;;  %v1013_v63 = vmul.f32 %v2494_v33, %v2494_v33  ;;  %v1014_v50 = vmul.f32 %v2505_v42, %v2505_v42 }
 0x165   :  { %3233 = vst [vmem:[#allocation18_spill] sm:$0xff] %v2554_v44  ;;  %v2565_v1 = vpop.eup %1830  ;;  %1860 = vpow2.f32 %v2458_v3  ;;  %v1102_v3 = vadd.f32 %v1101_v51, %v1011_v20  ;;  %v926_v19 = vadd.f32 %v2479_v57, %v925_v47  ;;  %v2595_v36 = vmul.f32 %v2411_v53, %v2411_v53 }
 0x166   :  { %v1833_v24 = vpop.eup %1832  ;;  %1862 = vpow2.f32 %v2468_v7  ;;  %v1066_v31 = vadd.f32 %v1065_v8, %v1012_v12  ;;  %v963_v46 = vadd.f32 %v2494_v33, %v962_v35  ;;  %v1015_v10 = vmul.f32 %v2510_v54, %v2510_v54 }
 0x167   :  { %v2575_v21 = vpop.eup %1834  ;;  %v756_v25 = vadd.f32 1.0, %v1833_v24  ;;  %v1016_v20 = vmul.f32 %v2524_v17, %v2524_v17  ;;  %v1103_v12 = vadd.f32 %v1102_v3, %v1013_v63  ;;  %v927_v47 = vadd.f32 %v2505_v42, %v926_v19 }
 0x168   :  { %v2581_v59 = vpop.eup %1836  ;;  %v1067_v8 = vadd.f32 %v1066_v31, %v1014_v50  ;;  %v1018_v33 = vmul.f32 %v2554_v44, %v2554_v44  ;;  %v771_v57 = vadd.f32 1.0, %v2543_v56  ;;  %v1017_v63 = vmul.f32 %v2536_v22, %v2536_v22 }
 0x169   :  { %v1839_v34 = vpop.eup %1838  ;;  %1864 = vrcp.f32 %v756_v25  ;;  %v770_v25 = vadd.f32 1.0, %v2519_v60  ;;  %v1104_v50 = vadd.f32 %v1103_v12, %v1015_v10 }
 0x16a   :  { %v2590_v24 = vpop.eup %1840  ;;  %1866 = vpow2.f32 %v2476_v43  ;;  %v772_v3 = vadd.f32 1.0, %v1839_v34  ;;  %v1068_v19 = vadd.f32 %v1067_v8, %v1016_v20 }
 0x16b   :  { %v1843_v7 = vpop.eup %1842  ;;  %1868 = vpow2.f32 %v2482_v62  ;;  %v964_v62 = vadd.f32 %v2510_v54, %v963_v46  ;;  %v1019_v46 = vmul.f32 %v2575_v21, %v2575_v21 }
 0x16c   :  { %v2602_v11 = vpop.eup %1844  ;;  %v757_v51 = vadd.f32 1.0, %v1843_v7  ;;  %1870 = vpow2.f32 %v2488_v26  ;;  %v928_v26 = vadd.f32 %v2524_v17, %v927_v47  ;;  %v1020_v7 = vmul.f32 %v2590_v24, %v2590_v24 }
 0x16d   :  { %v2608_v43 = vpop.eup %1846  ;;  %1872 = vpow2.f32 %v2500_v0  ;;  %v965_v34 = vadd.f32 %v2536_v22, %v964_v62 }
 0x16e   :  { %v1849_v35 = vpop.eup %1848  ;;  %1874 = vrcp.f32 %v757_v51  ;;  %v929_v56 = vadd.f32 %v2554_v44, %v928_v26 }
 0x16f   :  { %v2616_v60 = vpop.eup %1850  ;;  %1876 = vpow2.f32 %v2522_v2  ;;  %v773_v51 = vadd.f32 1.0, %v1849_v35  ;;  %v1069_v2 = vadd.f32 %v1068_v19, %v1018_v33  ;;  %v966_v62 = vadd.f32 %v2575_v21, %v965_v34 }
 0x170   :  { %v1853_v0 = vpop.eup %1852  ;;  %1878 = vrcp.f32 %v770_v25  ;;  %v1022_v10 = vmul.f32 %v2616_v60, %v2616_v60  ;;  %v1105_v25 = vadd.f32 %v1104_v50, %v1017_v63  ;;  %v930_v12 = vadd.f32 %v2590_v24, %v929_v56 }
 0x171   :  { %v1855_v31 = vpop.eup %1854  ;;  %1880 = vpow2.f32 %v2503_v41  ;;  %v774_v8 = vadd.f32 1.0, %v1853_v0  ;;  %v1070_v44 = vadd.f32 %v1069_v2, %v1020_v7  ;;  %v1021_v41 = vmul.f32 %v2608_v43, %v2608_v43 }
 0x172   :  { %v1857_v47 = vpop.eup %1856  ;;  %1882 = vrcp.f32 %v771_v57  ;;  %v775_v35 = vadd.f32 1.0, %v1855_v31  ;;  %v1106_v19 = vadd.f32 %v1105_v25, %v1019_v46  ;;  %v931_v57 = vadd.f32 %v2616_v60, %v930_v12 }
 0x173   :  { %v2631_v20 = vpop.eup %1858  ;;  %1884 = vrcp.f32 %v772_v3  ;;  %v1071_v50 = vadd.f32 %v1070_v44, %v1022_v10  ;;  %v776_v0 = vadd.f32 1.0, %v1857_v47  ;;  %v967_v44 = vadd.f32 %v2608_v43, %v966_v62 }
 0x174   :  { %v1861_v26 = vpop.eup %1860  ;;  %1886 = vpow2.f32 %v2529_v15  ;;  %v1023_v3 = vmul.f32 %v2631_v20, %v2631_v20  ;;  %v1107_v34 = vadd.f32 %v1106_v19, %v1021_v41  ;;  %v1032_v12 = vmul.f32 %v2439_v37, %v2439_v37 }
 0x175   :  { %v1863_v33 = vpop.eup %1862  ;;  %1888 = vrcp.f32 %v773_v51  ;;  %v777_v56 = vadd.f32 1.0, %v1861_v26  ;;  %v1031_v51 = vmul.f32 %v2425_v23, %v2425_v23 }
 0x176   :  { %v2639_v63 = vpop.eup %1864  ;;  %1890 = vpow2.f32 %v2541_v61  ;;  %v778_v10 = vadd.f32 1.0, %v1863_v33  ;;  %v1108_v26 = vadd.f32 %v1107_v34, %v1023_v3 }
 0x177   :  { %v1867_v7 = vpop.eup %1866  ;;  %v932_v31 = vadd.f32 %v2639_v63, %v931_v57  ;;  %v1024_v15 = vmul.f32 %v2639_v63, %v2639_v63  ;;  %1892 = vrcp.f32 %v774_v8  ;;  %v968_v8 = vadd.f32 %v2631_v20, %v967_v44 }
 0x178   :  { %v1869_v46 = vpop.eup %1868  ;;  %1894 = vrcp.f32 %v775_v35 }
 0x179   :  { %v1871_v2 = vpop.eup %1870  ;;  %v933_v47 = vadd.f32 %v2375_v9, %v932_v31  ;;  %v1072_v61 = vadd.f32 %v1071_v50, %v1024_v15  ;;  %1896 = vpow2.f32 %v2552_v38  ;;  %v780_v62 = vadd.f32 1.0, %v1869_v46 }
 0x17a   :  { %v1873_v25 = vpop.eup %1872  ;;  %1898 = vrcp.f32 %v776_v0  ;;  %v779_v50 = vadd.f32 1.0, %v1867_v7  ;;  %v781_v44 = vadd.f32 1.0, %v1871_v2 }
 0x17b   :  { %v2655_v57 = vpop.eup %1874  ;;  %v934_v41 = vadd.f32 %v2392_v29, %v933_v47  ;;  %v1073_v35 = vadd.f32 %v1072_v61, %v2492_v16  ;;  %1900 = vrcp.f32 %v777_v56  ;;  %v782_v15 = vadd.f32 1.0, %v1873_v25 }
 0x17c   :  { %v1877_v19 = vpop.eup %1876  ;;  %v969_v33 = vadd.f32 %v2655_v57, %v968_v8  ;;  %v1025_v38 = vmul.f32 %v2655_v57, %v2655_v57  ;;  %1902 = vpow2.f32 %v2569_v4 }
 0x17d   :  { %v2663_v31 = vpop.eup %1878  ;;  %v935_v3 = vadd.f32 %v2411_v53, %v934_v41  ;;  %v1074_v0 = vadd.f32 %v1073_v35, %v2534_v28  ;;  %1904 = vrcp.f32 %v778_v10  ;;  %v784_v47 = vadd.f32 1.0, %v1877_v19 }
 0x17e   :  { %v1881_v16 = vpop.eup %1880  ;;  %v970_v56 = vadd.f32 %v2381_v6, %v969_v33  ;;  %v1109_v46 = vadd.f32 %v1108_v26, %v1025_v38  ;;  %1906 = vpow2.f32 %v2573_v27  ;;  %v1034_v28 = vmul.f32 %v2548_v13, %v2548_v13 }
 0x17f   :  { %v2669_v34 = vpop.eup %1882  ;;  %v936_v7 = vadd.f32 %v2439_v37, %v935_v3  ;;  %v1075_v4 = vadd.f32 %v1074_v0, %v2595_v36  ;;  %1908 = vrcp.f32 %v780_v62  ;;  %v783_v26 = vadd.f32 1.0, %v1881_v16 }
 0x180   :  { %v2673_v61 = vpop.eup %1884  ;;  %v971_v10 = vadd.f32 %v2401_v30, %v970_v56  ;;  %v1110_v25 = vadd.f32 %v1109_v46, %v2517_v18  ;;  %1910 = vrcp.f32 %v779_v50  ;;  %v1033_v36 = vmul.f32 %v2471_v39, %v2471_v39 }
 0x181   :  { %v1887_v2 = vpop.eup %1886  ;;  %v1076_v27 = vadd.f32 %v1075_v4, %v1032_v12  ;;  %v937_v8 = vadd.f32 %v2548_v13, %v936_v7  ;;  %1912 = vrcp.f32 %v782_v15  ;;  %v1036_v18 = vmul.f32 %v2581_v59, %v2581_v59 }
 0x182   :  { %v2680_v41 = vpop.eup %1888  ;;  %v972_v35 = vadd.f32 %v2425_v23, %v971_v10  ;;  %v1111_v62 = vadd.f32 %v1110_v25, %v2562_v14  ;;  %1914 = vrcp.f32 %v781_v44  ;;  %v785_v0 = vadd.f32 1.0, %v1887_v2 }
 0x183   :  { %v1891_v19 = vpop.eup %1890  ;;  %v938_v12 = vadd.f32 %v2581_v59, %v937_v8  ;;  %v1077_v33 = vadd.f32 %v1076_v27, %v1034_v28  ;;  %1916 = vrcp.f32 %v784_v47  ;;  %v1038_v14 = vmul.f32 %v2663_v31, %v2663_v31 }
 0x184   :  { %v2689_v38 = vpop.eup %1892  ;;  %v973_v50 = vadd.f32 %v2471_v39, %v972_v35  ;;  %v1112_v3 = vadd.f32 %v1111_v62, %v1031_v51  ;;  %v786_v15 = vadd.f32 1.0, %v1891_v19  ;;  %1918 = vrcp.f32 %v783_v26 }
 0x185   :  { %3234 = vst [vmem:[#allocation19_spill] sm:$0xff] %v2689_v38  ;;  %v2692_v16 = vpop.eup %1894  ;;  %v939_v56 = vadd.f32 %v2663_v31, %v938_v12  ;;  %v1078_v46 = vadd.f32 %v1077_v33, %v1036_v18  ;;  %v1035_v7 = vmul.f32 %v2565_v1, %v2565_v1  ;;  %v1040_v28 = vmul.f32 %v2673_v61, %v2673_v61 }
 0x186   :  { %3235 = vst [vmem:[#allocation20_spill] sm:$0xff] %v2692_v16  ;;  %v1897_v44 = vpop.eup %1896  ;;  %v1113_v4 = vadd.f32 %v1112_v3, %v1033_v36  ;;  %v974_v47 = vadd.f32 %v2565_v1, %v973_v50  ;;  %1920 = vrcp.f32 %v786_v15  ;;  %v1037_v8 = vmul.f32 %v2602_v11, %v2602_v11 }
 0x187   :  { %v2700_v51 = vpop.eup %1898  ;;  %v940_v10 = vadd.f32 %v2673_v61, %v939_v56  ;;  %v1079_v25 = vadd.f32 %v1078_v46, %v1038_v14  ;;  %v787_v2 = vadd.f32 1.0, %v1897_v44  ;;  %1922 = vrcp.f32 %v785_v0 }
 0x188   :  { %3236 = vst [vmem:[#allocation21_spill] sm:$0xff] %v2700_v51  ;;  %v2705_v27 = vpop.eup %1900  ;;  %v975_v26 = vadd.f32 %v2602_v11, %v974_v47  ;;  %v1114_v36 = vadd.f32 %v1113_v4, %v1035_v7  ;;  %v1042_v19 = vmul.f32 %v2689_v38, %v2689_v38  ;;  %v1039_v33 = vmul.f32 %v2669_v34, %v2669_v34 }
 0x189   :  { %3237 = vst [vmem:[#allocation22_spill] sm:$0xff] %v2705_v27  ;;  %v1903_v35 = vpop.eup %1902  ;;  %v941_v62 = vadd.f32 %v2689_v38, %v940_v10  ;;  %v1080_v18 = vadd.f32 %v1079_v25, %v1040_v28  ;;  %1924 = vrcp.f32 %v787_v2  ;;  %v1041_v0 = vmul.f32 %v2680_v41, %v2680_v41 }
 0x18a   :  { %v2713_v12 = vpop.eup %1904  ;;  %v976_v50 = vadd.f32 %v2669_v34, %v975_v26  ;;  %v1115_v3 = vadd.f32 %v1114_v36, %v1037_v8  ;;  %v788_v15 = vadd.f32 1.0, %v1903_v35  ;;  %v1044_v44 = vmul.f32 %v2700_v51, %v2700_v51 }
 0x18b   :  { %3238 = vst [vmem:[#allocation23_spill] sm:$0xff] %v2713_v12  ;;  %v1907_v14 = vpop.eup %1906  ;;  %v1081_v56 = vadd.f32 %v1080_v18, %v1042_v19  ;;  %v942_v46 = vadd.f32 %v2700_v51, %v941_v62  ;;  %v1046_v8 = vmul.f32 %v2713_v12, %v2713_v12  ;;  %v1043_v35 = vmul.f32 %v2692_v16, %v2692_v16 }
 0x18c   :  { %v2723_v7 = vpop.eup %1908  ;;  %v977_v4 = vadd.f32 %v2680_v41, %v976_v50  ;;  %v1116_v47 = vadd.f32 %v1115_v3, %v1039_v33  ;;  %1926 = vrcp.f32 %v788_v15  ;;  %v789_v28 = vadd.f32 1.0, %v1907_v14 }
 0x18d   :  { %3239 = vst [vmem:[#allocation24_spill] sm:$0xff] %v2723_v7  ;;  %v2726_v10 = vpop.eup %1910  ;;  %v1082_v25 = vadd.f32 %v1081_v56, %v1044_v44  ;;  %v943_v2 = vadd.f32 %v2713_v12, %v942_v46  ;;  %v1048_v50 = vmul.f32 %v2723_v7, %v2723_v7  ;;  %v1045_v56 = vmul.f32 %v2705_v27, %v2705_v27 }
 0x18e   :  { %3240 = vst [vmem:[#allocation25_spill] sm:$0xff] %v2726_v10  ;;  %v2731_v26 = vpop.eup %1912  ;;  %v978_v36 = vadd.f32 %v2692_v16, %v977_v4  ;;  %v1117_v62 = vadd.f32 %v1116_v47, %v1041_v0  ;;  %1928 = vrcp.f32 %v789_v28 }
 0x18f   :  { %3241 = vst [vmem:[#allocation26_spill] sm:$0xff] %v2731_v26  ;;  %v2736_v19 = vpop.eup %1914  ;;  %v1083_v18 = vadd.f32 %v1082_v25, %v1046_v8  ;;  %v944_v33 = vadd.f32 %v2723_v7, %v943_v2  ;;  %v1050_v44 = vmul.f32 %v2731_v26, %v2731_v26  ;;  %v1047_v25 = vmul.f32 %v2726_v10, %v2726_v10 }
 0x190   :  { %3242 = vst [vmem:[#allocation27_spill] sm:$0xff] %v2736_v19  ;;  %v2741_v3 = vpop.eup %1916  ;;  %v1118_v15 = vadd.f32 %v1117_v62, %v1043_v35  ;;  %v979_v14 = vadd.f32 %v2705_v27, %v978_v36 }
 0x191   :  { %3243 = vst [vmem:[#allocation28_spill] sm:$0xff] %v2741_v3  ;;  %v1084_v46 = vadd.f32 %v1083_v18, %v1048_v50  ;;  %v945_v0 = vadd.f32 %v2731_v26, %v944_v33  ;;  %v2749_v4 = vpop.eup %1918  ;;  %v1052_v35 = vmul.f32 %v2741_v3, %v2741_v3  ;;  %v1049_v33 = vmul.f32 %v2736_v19, %v2736_v19 }
 0x192   :  { %3244 = vst [vmem:[#allocation29_spill] sm:$0xff] %v2749_v4  ;;  %v1119_v47 = vadd.f32 %v1118_v15, %v1045_v56  ;;  %v980_v28 = vadd.f32 %v2726_v10, %v979_v14  ;;  %v1051_v15 = vmul.f32 %v2749_v4, %v2749_v4 }
 0x193   :  { %v2754_v2 = vpop.eup %1920  ;;  %v1085_v8 = vadd.f32 %v1084_v46, %v1050_v44  ;;  %v946_v36 = vadd.f32 %v2741_v3, %v945_v0 }
 0x194   :  { %3245 = vst [vmem:[#allocation30_spill] sm:$0xff] %v2754_v2  ;;  %v1120_v62 = vadd.f32 %v1119_v47, %v1047_v25  ;;  %v981_v18 = vadd.f32 %v2736_v19, %v980_v28  ;;  %v2762_v50 = vpop.eup %1922  ;;  %v1054_v47 = vmul.f32 %v2754_v2, %v2754_v2 }
 0x195   :  { %3246 = vst [vmem:[#allocation31_spill] sm:$0xff] %v2762_v50  ;;  %v1086_v14 = vadd.f32 %v1085_v8, %v1052_v35  ;;  %v947_v44 = vadd.f32 %v2754_v2, %v946_v36  ;;  %v1053_v3 = vmul.f32 %v2762_v50, %v2762_v50 }
 0x196   :  { %v2766_v56 = vpop.eup %1924  ;;  %v1121_v46 = vadd.f32 %v1120_v62, %v1049_v33  ;;  %v982_v0 = vadd.f32 %v2749_v4, %v981_v18 }
 0x197   :  { %3247 = vst [vmem:[#allocation32_spill] sm:$0xff] %v2766_v56  ;;  %v1087_v26 = vadd.f32 %v1086_v14, %v1054_v47  ;;  %v1055_v8 = vmul.f32 %v2766_v56, %v2766_v56 }
 0x198   :  { %v1122_v28 = vadd.f32 %v1121_v46, %v1051_v15  ;;  %v983_v25 = vadd.f32 %v2762_v50, %v982_v0 }
 0x199   :  { %v2775_v19 = vpop.eup %1926 }
 0x19a   :  { %3248 = vst [vmem:[#allocation33_spill] sm:$0xff] %v2775_v19  ;;  %v1123_v35 = vadd.f32 %v1122_v28, %v1053_v3  ;;  %v984_v62 = vadd.f32 %v2766_v56, %v983_v25  ;;  %v948_v36 = vadd.f32 %v2775_v19, %v947_v44  ;;  %v1056_v18 = vmul.f32 %v2775_v19, %v2775_v19 }
 0x19b   :  { %v1929_v33 = vpop.eup %1928 }
 0x19c   :  { %v1124_v15 = vadd.f32 %v1123_v35, %v1055_v8  ;;  %v949_v46 = vrot.slane %v948_v36, 4  ;;  %v1088_v0 = vadd.f32 %v1087_v26, %v1056_v18  ;;  %v985_v2 = vadd.f32 %v1929_v33, %v984_v62 }
 0x19d   :  { %v1057_v50 = vmul.f32 %v1929_v33, %v1929_v33 }
 0x19e   :  { %v950_v14 = vadd.f32 %v949_v46, %v948_v36  ;;  %v1089_v47 = vrot.slane %v1088_v0, 4  ;;  %v986_v4 = vrot.slane %v985_v2, 4 }
 0x19f   :  { %v1125_v7 = vadd.f32 %v1124_v15, %v1057_v50 }
 0x1a0   :  { %v951_v10 = vrot.slane %v950_v14, 2  ;;  %v1090_v12 = vadd.f32 %v1089_v47, %v1088_v0  ;;  %v987_v3 = vadd.f32 %v986_v4, %v985_v2 }
 0x1a1   :  { %v1126_v28 = vrot.slane %v1125_v7, 4 }
 0x1a2   :  { %v952_v25 = vadd.f32 %v951_v10, %v950_v14  ;;  %v1091_v56 = vrot.slane %v1090_v12, 2  ;;  %v988_v44 = vrot.slane %v987_v3, 2 }
 0x1a3   :  { %v1127_v27 = vadd.f32 %v1126_v28, %v1125_v7 }
 0x1a4   :  { %v953_v51 = vrot.slane %v952_v25, 1  ;;  %v1092_v19 = vadd.f32 %v1091_v56, %v1090_v12  ;;  %v989_v16 = vadd.f32 %v988_v44, %v987_v3  ;;  %v1149_v3 = vlaneseq }
 0x1a5   :  { %v1128_v8 = vrot.slane %v1127_v27, 2 }
 0x1a6   :  { %v954_v35 = vadd.f32 %v953_v51, %v952_v25  ;;  %v1093_v26 = vrot.slane %v1092_v19, 1  ;;  %v990_v62 = vrot.slane %v989_v16, 1  ;;  %v1956_v51 = vmov 1966171168  }
 0x1a7   :  { %v1129_v18 = vadd.f32 %v1128_v8, %v1127_v27  ;;  %v1147_v56 = vunpack.c.l.s4 %v1956_v51  ;;  %v1150_v25 = vshrl.u32 %v1149_v3, 7 }
 0x1a8   :  { %v992_v36 = vmul.f32 0.00390625, %v954_v35  ;;  %v1094_v46 = vadd.f32 %v1093_v26, %v1092_v19  ;;  %v991_v38 = vadd.f32 %v990_v62, %v989_v16 }
 0x1a9   :  { %v1130_v50 = vrot.slane %v1129_v18, 1  ;;  %v1148_v27 = vunpack.c.0.s8 %v1147_v56  ;;  %v1166_v62 = vsub.s32 0, %v1150_v25 }
 0x1aa   :  { %v1132_v15 = vmul.f32 0.00390625, %v1094_v46  ;;  %v1134_v0 = vmul.f32 %v992_v36, %v992_v36  ;;  %v993_v4 = vmul.f32 0.00390625, %v991_v38  ;;  %v1138_v38 = vld [vmem:[%s3192_s3] sm:$0x3] }
 0x1ab   :  { %v1131_v2 = vadd.f32 %v1130_v50, %v1129_v18  ;;  %v1151_v16 = vsub.s32 %v1148_v27, %v1150_v25  ;;  %v1170_v18 = vsub.s32 1, %v1150_v25  ;;  %v3254_v27 = vld [vmem:[#allocation12_spill] sm:$0xff] }
 0x1ac   :  { %v1136_v10 = vsub.f32 %v1132_v15, %v1134_v0  ;;  %v1135_v14 = vmul.f32 %v993_v4, %v993_v4 }
 0x1ad   :  { %v1133_v47 = vmul.f32 0.00390625, %v1131_v2 }
 0x1ae   :  { %v1139_v7 = vadd.f32 1e-05, %v1136_v10 }
 0x1af   :  { %v1137_v28 = vsub.f32 %v1133_v47, %v1135_v14 }
 0x1b0   :  { %1930 = vrsqrt.f32 %v1139_v7 }
 0x1b1   :  { %v1140_v12 = vadd.f32 1e-05, %v1137_v28 }
 0x1b3   :  { %1932 = vrsqrt.f32 %v1140_v12 }
 0x1bd   :  { %v1931_v19 = vpop.eup %1930 }
 0x1c0   :  { %v1933_v44 = vpop.eup %1932 }
 0x1c1   :  { %v1145_v8 = vcombine.low %v1931_v19, %v1933_v44  ;;  %v3255_v19 = vld [vmem:[#allocation13_spill] sm:$0xff] }
 0x1c3   :  { %v1152_v35 = vrot.slane %v1145_v8, %v1151_v16 }
 0x1c5   :  { %v1159_v26 = vrot.slane %v1152_v35, %v1151_v16  ;;  %v3256_v35 = vld [vmem:[#allocation14_spill] sm:$0xff] }
 0x1c7   :  { %v1161_v46 = vmul.f32 %v1159_v26, %v1138_v38  ;;  %v3257_v26 = vld [vmem:[#allocation15_spill] sm:$0xff] }
 0x1c9   :  { %v2786_v50 = vrot.slane %v1161_v46, %v1166_v62  ;;  %v2788_v15 = vrot.slane %v1161_v46, %v1170_v18 }
 0x1cb   :  { %v1174_v0 = vmul.f32 %v2786_v50, %v992_v36  ;;  %v1175_v2 = vmul.f32 %v2788_v15, %v993_v4  ;;  %v1258_v10 = vmul.f32 %v1929_v33, %v2788_v15  ;;  %v2795_v14 = vmul.f32 %v2348_v32, %v2786_v50  ;;  %v3249_v32 = vld [vmem:[#allocation7_spill] sm:$0xff] }
 0x1cc   :  { %v2799_v47 = vmul.f32 %v2352_v40, %v2788_v15  ;;  %v2803_v7 = vmul.f32 %v2355_v45, %v2786_v50  ;;  %v2807_v28 = vmul.f32 %v2359_v52, %v2788_v15  ;;  %v2811_v36 = vmul.f32 %v2362_v58, %v2786_v50  ;;  %v3250_v40 = vld [vmem:[#allocation8_spill] sm:$0xff]  ;;  %v3251_v45 = vld [vmem:[#allocation9_spill] sm:$0xff]  ;;  %v3252_v52 = vld [vmem:[#allocation10_spill] sm:$0xff] }
 0x1cd   :  { %v1178_v33 = vcombine.low %v1174_v0, %v1175_v2  ;;  %v2815_v4 = vmul.f32 %v3249_v32, %v2788_v15  ;;  %v2819_v12 = vmul.f32 %v3250_v40, %v2786_v50  ;;  %v2823_v51 = vmul.f32 %v3251_v45, %v2788_v15  ;;  %v3253_v58 = vld [vmem:[#allocation11_spill] sm:$0xff]  ;;  %v3258_v45 = vld [vmem:[#allocation16_spill] sm:$0xff] }
 0x1ce   :  { %v2827_v56 = vmul.f32 %v3252_v52, %v2786_v50  ;;  %v2831_v3 = vmul.f32 %v3253_v58, %v2788_v15  ;;  %v2835_v25 = vmul.f32 %v3254_v27, %v2786_v50  ;;  %v2839_v44 = vmul.f32 %v3255_v19, %v2788_v15  ;;  %v1162_v2 = vld [vmem:[%s3193_s4] sm:$0x3]  ;;  %v3259_v58 = vld [vmem:[#allocation17_spill] sm:$0xff]  ;;  %s1957_s4 = smov [#allocation4]  }
 0x1cf   :  { %v1185_v8 = vrot.slane %v1178_v33, %v1151_v16  ;;  %v2843_v38 = vmul.f32 %v3256_v35, %v2786_v50  ;;  %v2847_v46 = vmul.f32 %v3257_v26, %v2788_v15  ;;  %v2851_v0 = vmul.f32 %v2406_v49, %v2786_v50  ;;  %s1403_s15 = sshll.u32 %s1957_s4, 4  ;;  %s3171_s15 = int_to_ptr.vmem [resolvable:$true] %s1403_s15 }
 0x1d0   :  { %v2858_v32 = vmul.f32 %v2409_v55, %v2788_v15  ;;  %v2862_v33 = vmul.f32 %v2416_v5, %v2786_v50  ;;  %v2866_v40 = vmul.f32 %v2460_v48, %v2788_v15  ;;  %v2870_v49 = vmul.f32 %v3258_v45, %v2786_v50  ;;  %s1934_s16 = scalar_lea.vmem %s3171_s15, 8192  ;;  %p1939_p1 = scmp.lt.s32.totalorder %s3171_s15, %s3171_s15 }
 0x1d1   :  { %v1192_v52 = vrot.slane %v1185_v8, %v1151_v16  ;;  %v2874_v27 = vmul.f32 %v3259_v58, %v2788_v15  ;;  %v2878_v55 = vmul.f32 %v2505_v42, %v2786_v50  ;;  %v2882_v5 = vmul.f32 %v2510_v54, %v2788_v15  ;;  %v3260_v16 = vld [vmem:[#allocation18_spill] sm:$0xff]  ;;  %p1935_p0 = scmp.ne.s32.totalorder %s3171_s15, %s1934_s16  ;;  %p1940_p2 = scmp.lt.s32.totalorder %s1934_s16, %s1934_s16 }
 0x1d2   :  { %v2886_v48 = vmul.f32 %v2524_v17, %v2786_v50  ;;  %v2890_v19 = vmul.f32 %v2536_v22, %v2788_v15  ;;  %v2894_v8 = vmul.f32 %v3260_v16, %v2786_v50  ;;  %v2898_v42 = vmul.f32 %v2575_v21, %v2788_v15  ;;  %v3266_v58 = vld [vmem:[#allocation22_spill] sm:$0xff]  ;;  %v3268_v16 = vld [vmem:[#allocation23_spill] sm:$0xff] }
 0x1d3   :  { %v1194_v35 = vsub.f32 %v1162_v2, %v1192_v52  ;;  %v2902_v54 = vmul.f32 %v2590_v24, %v2786_v50  ;;  %v2906_v17 = vmul.f32 %v2608_v43, %v2788_v15  ;;  %v2910_v22 = vmul.f32 %v2616_v60, %v2786_v50  ;;  %p1941_p3 = por %p1940_p2, %p1939_p1 }
 0x1d4   :  { %v2914_v26 = vmul.f32 %v2631_v20, %v2788_v15  ;;  %v2918_v21 = vmul.f32 %v2639_v63, %v2786_v50  ;;  %v2922_v24 = vmul.f32 %v2655_v57, %v2788_v15  ;;  %v2926_v43 = vmul.f32 %v2375_v9, %v2786_v50 }
 0x1d5   :  { %v2928_v2 = vrot.slane %v1194_v35, %v1166_v62  ;;  %v2930_v60 = vrot.slane %v1194_v35, %v1170_v18  ;;  %v2934_v20 = vmul.f32 %v2381_v6, %v2788_v15  ;;  %v2938_v63 = vmul.f32 %v2392_v29, %v2786_v50  ;;  %v3270_v35 = vld [vmem:[#allocation25_spill] sm:$0xff]  ;;  %p1942_p4 = pnand %p1941_p3, %p1935_p0 }
 0x1d6   :  { %v2942_v57 = vmul.f32 %v2401_v30, %v2788_v15  ;;  %v2946_v9 = vmul.f32 %v2411_v53, %v2786_v50  ;;  %v2950_v62 = vmul.f32 %v2425_v23, %v2788_v15  ;;  %v2954_v6 = vmul.f32 %v2439_v37, %v2786_v50 }
 0x1d7   :  { %v1333_v18 = vadd.f32 %v2930_v60, %v1258_v10  ;;  %v2959_v29 = vmul.f32 %v2471_v39, %v2788_v15  ;;  %v2963_v30 = vmul.f32 %v2548_v13, %v2786_v50  ;;  %v2967_v53 = vmul.f32 %v2565_v1, %v2788_v15 }
 0x1d8   :  { %v2971_v23 = vmul.f32 %v2581_v59, %v2786_v50  ;;  %v2975_v37 = vmul.f32 %v2602_v11, %v2788_v15  ;;  %v2979_v39 = vmul.f32 %v2663_v31, %v2786_v50  ;;  %v2983_v13 = vmul.f32 %v2669_v34, %v2788_v15  ;;  %v3261_v11 = vld [vmem:[#allocation19_spill] sm:$0xff]  ;;  %v3262_v31 = vld [vmem:[#allocation20_spill] sm:$0xff]  ;;  %v3264_v34 = vld [vmem:[#allocation21_spill] sm:$0xff] }
 0x1d9   :  { %1397 = vst [vmem:[#allocation4 + $0x1f8] sm:$0xff] %v1333_v18  ;;  %v2987_v1 = vmul.f32 %v2673_v61, %v2786_v50  ;;  %v2991_v59 = vmul.f32 %v2680_v41, %v2788_v15  ;;  %v2995_v10 = vmul.f32 %v3261_v11, %v2786_v50  ;;  %v2999_v45 = vmul.f32 %v3262_v31, %v2788_v15  ;;  %v3272_v11 = vld [vmem:[#allocation24_spill] sm:$0xff] }
 0x1da   :  { %v3003_v52 = vmul.f32 %v3264_v34, %v2786_v50  ;;  %v3007_v61 = vmul.f32 %v3266_v58, %v2788_v15  ;;  %v3011_v41 = vmul.f32 %v3268_v16, %v2786_v50  ;;  %v3015_v18 = vmul.f32 %v3270_v35, %v2788_v15 }
 0x1db   :  { %3263 = vst [vmem:[#allocation7_spill] sm:$0xff] %v2999_v45  ;;  %v3019_v31 = vmul.f32 %v3272_v11, %v2786_v50  ;;  %v3274_v45 = vld [vmem:[#allocation27_spill] sm:$0xff] }
 0x1dc   :  { %3265 = vst [vmem:[#allocation8_spill] sm:$0xff] %v3003_v52  ;;  %3267 = vst [vmem:[#allocation9_spill] sm:$0xff] %v3007_v61  ;;  %v3023_v34 = vmul.f32 %v3274_v45, %v2788_v15  ;;  %v3276_v52 = vld [vmem:[#allocation26_spill] sm:$0xff]  ;;  %v3278_v61 = vld [vmem:[#allocation29_spill] sm:$0xff] }
 0x1dd   :  { %3269 = vst [vmem:[#allocation10_spill] sm:$0xff] %v3011_v41  ;;  %3271 = vst [vmem:[#allocation11_spill] sm:$0xff] %v3015_v18  ;;  %v3027_v58 = vmul.f32 %v3276_v52, %v2786_v50  ;;  %v3031_v16 = vmul.f32 %v3278_v61, %v2788_v15  ;;  %v3279_v41 = vld [vmem:[#allocation28_spill] sm:$0xff]  ;;  %v3281_v18 = vld [vmem:[#allocation31_spill] sm:$0xff] }
 0x1de   :  { %3273 = vst [vmem:[#allocation12_spill] sm:$0xff] %v3019_v31  ;;  %3275 = vst [vmem:[#allocation13_spill] sm:$0xff] %v3023_v34  ;;  %v3035_v35 = vmul.f32 %v3279_v41, %v2786_v50  ;;  %v3039_v11 = vmul.f32 %v3281_v18, %v2788_v15  ;;  %v3282_v31 = vld [vmem:[#allocation30_spill] sm:$0xff]  ;;  %v3283_v34 = vld [vmem:[#allocation32_spill] sm:$0xff]  ;;  %v1270_v41 = vadd.f32 %v2928_v2, %v2795_v14 }
 0x1df   :  { %3277 = vst [vmem:[#allocation14_spill] sm:$0xff] %v3027_v58  ;;  %v3043_v45 = vmul.f32 %v3282_v31, %v2786_v50  ;;  %v3047_v52 = vmul.f32 %v3283_v34, %v2788_v15  ;;  %v3284_v58 = vld [vmem:[#allocation33_spill] sm:$0xff]  ;;  %v1272_v18 = vadd.f32 %v2928_v2, %v2803_v7  ;;  %v1273_v31 = vadd.f32 %v2930_v60, %v2807_v28 }
 0x1e0   :  { %3280 = vst [vmem:[#allocation15_spill] sm:$0xff] %v3035_v35  ;;  %v3051_v61 = vmul.f32 %v3284_v58, %v2786_v50  ;;  %v1271_v35 = vadd.f32 %v2930_v60, %v2799_v47  ;;  %v1274_v15 = vadd.f32 %v2928_v2, %v2811_v36  ;;  %v1275_v34 = vadd.f32 %v2930_v60, %v2815_v4 }
 0x1e1   :  { %v1276_v50 = vadd.f32 %v2928_v2, %v2819_v12  ;;  %v1277_v14 = vadd.f32 %v2930_v60, %v2823_v51  ;;  %v1278_v47 = vadd.f32 %v2928_v2, %v2827_v56  ;;  %v1279_v7 = vadd.f32 %v2930_v60, %v2831_v3  ;;  %1334 = vst [vmem:[#allocation4] sm:$0xff] %v1270_v41 }
 0x1e2   :  { %v1280_v28 = vadd.f32 %v2928_v2, %v2835_v25  ;;  %1335 = vst [vmem:[#allocation4 + $0x8] sm:$0xff] %v1271_v35  ;;  %1336 = vst [vmem:[#allocation4 + $0x10] sm:$0xff] %v1272_v18  ;;  %v1281_v36 = vadd.f32 %v2930_v60, %v2839_v44  ;;  %v1282_v4 = vadd.f32 %v2928_v2, %v2843_v38 }
 0x1e3   :  { %v1283_v12 = vadd.f32 %v2930_v60, %v2847_v46  ;;  %v1284_v51 = vadd.f32 %v2928_v2, %v2851_v0  ;;  %1337 = vst [vmem:[#allocation4 + $0x18] sm:$0xff] %v1273_v31  ;;  %1338 = vst [vmem:[#allocation4 + $0x20] sm:$0xff] %v1274_v15  ;;  %v1285_v56 = vadd.f32 %v2930_v60, %v2858_v32 }
 0x1e4   :  { %1339 = vst [vmem:[#allocation4 + $0x28] sm:$0xff] %v1275_v34  ;;  %1340 = vst [vmem:[#allocation4 + $0x30] sm:$0xff] %v1276_v50  ;;  %v1286_v3 = vadd.f32 %v2928_v2, %v2862_v33  ;;  %v1287_v25 = vadd.f32 %v2930_v60, %v2866_v40  ;;  %v1288_v44 = vadd.f32 %v2928_v2, %v2870_v49  ;;  %v3288_v35 = vld [vmem:[#allocation10_spill] sm:$0xff] }
 0x1e5   :  { %1341 = vst [vmem:[#allocation4 + $0x38] sm:$0xff] %v1277_v14  ;;  %1342 = vst [vmem:[#allocation4 + $0x40] sm:$0xff] %v1278_v47  ;;  %v1289_v38 = vadd.f32 %v2930_v60, %v2874_v27  ;;  %v1290_v46 = vadd.f32 %v2928_v2, %v2878_v55  ;;  %v1291_v0 = vadd.f32 %v2930_v60, %v2882_v5  ;;  %v3291_v15 = vld [vmem:[#allocation13_spill] sm:$0xff] }
 0x1e6   :  { %1343 = vst [vmem:[#allocation4 + $0x48] sm:$0xff] %v1279_v7  ;;  %1344 = vst [vmem:[#allocation4 + $0x50] sm:$0xff] %v1280_v28  ;;  %v1292_v32 = vadd.f32 %v2928_v2, %v2886_v48  ;;  %v1293_v33 = vadd.f32 %v2930_v60, %v2890_v19  ;;  %v1294_v40 = vadd.f32 %v2928_v2, %v2894_v8  ;;  %v3292_v50 = vld [vmem:[#allocation14_spill] sm:$0xff] }
 0x1e7   :  { %1345 = vst [vmem:[#allocation4 + $0x58] sm:$0xff] %v1281_v36  ;;  %1346 = vst [vmem:[#allocation4 + $0x60] sm:$0xff] %v1282_v4  ;;  %v1295_v49 = vadd.f32 %v2930_v60, %v2898_v42  ;;  %v1296_v27 = vadd.f32 %v2928_v2, %v2902_v54  ;;  %v1297_v55 = vadd.f32 %v2930_v60, %v2906_v17  ;;  %v3293_v7 = vld [vmem:[#allocation15_spill] sm:$0xff] }
 0x1e8   :  { %1347 = vst [vmem:[#allocation4 + $0x68] sm:$0xff] %v1283_v12  ;;  %1348 = vst [vmem:[#allocation4 + $0x70] sm:$0xff] %v1284_v51  ;;  %v1298_v5 = vadd.f32 %v2928_v2, %v2910_v22  ;;  %v1299_v48 = vadd.f32 %v2930_v60, %v2914_v26  ;;  %v1300_v19 = vadd.f32 %v2928_v2, %v2918_v21 }
 0x1e9   :  { %1349 = vst [vmem:[#allocation4 + $0x78] sm:$0xff] %v1285_v56  ;;  %1350 = vst [vmem:[#allocation4 + $0x80] sm:$0xff] %v1286_v3  ;;  %v1301_v8 = vadd.f32 %v2930_v60, %v2922_v24  ;;  %v1302_v42 = vadd.f32 %v2928_v2, %v2926_v43  ;;  %v1303_v54 = vadd.f32 %v2930_v60, %v2934_v20 }
 0x1ea   :  { %1351 = vst [vmem:[#allocation4 + $0x88] sm:$0xff] %v1287_v25  ;;  %1352 = vst [vmem:[#allocation4 + $0x90] sm:$0xff] %v1288_v44  ;;  %v1304_v17 = vadd.f32 %v2928_v2, %v2938_v63  ;;  %v1305_v22 = vadd.f32 %v2930_v60, %v2942_v57  ;;  %v1306_v26 = vadd.f32 %v2928_v2, %v2946_v9 }
 0x1eb   :  { %1353 = vst [vmem:[#allocation4 + $0x98] sm:$0xff] %v1289_v38  ;;  %1354 = vst [vmem:[#allocation4 + $0xa0] sm:$0xff] %v1290_v46  ;;  %v1307_v21 = vadd.f32 %v2930_v60, %v2950_v62  ;;  %v1308_v24 = vadd.f32 %v2928_v2, %v2954_v6  ;;  %v1309_v43 = vadd.f32 %v2930_v60, %v2959_v29 }
 0x1ec   :  { %1355 = vst [vmem:[#allocation4 + $0xa8] sm:$0xff] %v1291_v0  ;;  %1356 = vst [vmem:[#allocation4 + $0xb0] sm:$0xff] %v1292_v32  ;;  %v1310_v20 = vadd.f32 %v2928_v2, %v2963_v30  ;;  %v1311_v63 = vadd.f32 %v2930_v60, %v2967_v53  ;;  %v1312_v57 = vadd.f32 %v2928_v2, %v2971_v23  ;;  %v3285_v23 = vld [vmem:[#allocation7_spill] sm:$0xff] }
 0x1ed   :  { %1357 = vst [vmem:[#allocation4 + $0xb8] sm:$0xff] %v1293_v33  ;;  %1358 = vst [vmem:[#allocation4 + $0xc0] sm:$0xff] %v1294_v40  ;;  %v1313_v9 = vadd.f32 %v2930_v60, %v2975_v37  ;;  %v1314_v62 = vadd.f32 %v2928_v2, %v2979_v39  ;;  %v1315_v6 = vadd.f32 %v2930_v60, %v2983_v13  ;;  %v3286_v39 = vld [vmem:[#allocation8_spill] sm:$0xff] }
 0x1ee   :  { %1359 = vst [vmem:[#allocation4 + $0xc8] sm:$0xff] %v1295_v49  ;;  %1360 = vst [vmem:[#allocation4 + $0xd0] sm:$0xff] %v1296_v27  ;;  %v1316_v29 = vadd.f32 %v2928_v2, %v2987_v1  ;;  %v1317_v30 = vadd.f32 %v2930_v60, %v2991_v59  ;;  %v1318_v53 = vadd.f32 %v2928_v2, %v2995_v10  ;;  %v3287_v1 = vld [vmem:[#allocation9_spill] sm:$0xff]  ;;  %v3289_v59 = vld [vmem:[#allocation11_spill] sm:$0xff] }
 0x1ef   :  { %1361 = vst [vmem:[#allocation4 + $0xd8] sm:$0xff] %v1297_v55  ;;  %1362 = vst [vmem:[#allocation4 + $0xe0] sm:$0xff] %v1298_v5  ;;  %v1319_v37 = vadd.f32 %v2930_v60, %v3285_v23  ;;  %v1320_v13 = vadd.f32 %v2928_v2, %v3286_v39  ;;  %v1321_v58 = vadd.f32 %v2930_v60, %v3287_v1  ;;  %v3290_v10 = vld [vmem:[#allocation12_spill] sm:$0xff] }
 0x1f0   :  { %1363 = vst [vmem:[#allocation4 + $0xe8] sm:$0xff] %v1299_v48  ;;  %1364 = vst [vmem:[#allocation4 + $0xf0] sm:$0xff] %v1300_v19  ;;  %v1322_v41 = vadd.f32 %v2928_v2, %v3288_v35  ;;  %v1323_v18 = vadd.f32 %v2930_v60, %v3289_v59  ;;  %v1324_v31 = vadd.f32 %v2928_v2, %v3290_v10 }
 0x1f1   :  { %1365 = vst [vmem:[#allocation4 + $0xf8] sm:$0xff] %v1301_v8  ;;  %1366 = vst [vmem:[#allocation4 + $0x100] sm:$0xff] %v1302_v42  ;;  %v1325_v34 = vadd.f32 %v2930_v60, %v3291_v15  ;;  %v1326_v14 = vadd.f32 %v2928_v2, %v3292_v50  ;;  %v1327_v47 = vadd.f32 %v2930_v60, %v3031_v16 }
 0x1f2   :  { %1367 = vst [vmem:[#allocation4 + $0x108] sm:$0xff] %v1303_v54  ;;  %1368 = vst [vmem:[#allocation4 + $0x110] sm:$0xff] %v1304_v17  ;;  %v1328_v28 = vadd.f32 %v2928_v2, %v3293_v7  ;;  %v1329_v36 = vadd.f32 %v2930_v60, %v3039_v11  ;;  %v1330_v4 = vadd.f32 %v2928_v2, %v3043_v45 }
 0x1f3   :  { %1369 = vst [vmem:[#allocation4 + $0x118] sm:$0xff] %v1305_v22  ;;  %1370 = vst [vmem:[#allocation4 + $0x120] sm:$0xff] %v1306_v26  ;;  %v1331_v16 = vadd.f32 %v2930_v60, %v3047_v52  ;;  %v1332_v12 = vadd.f32 %v2928_v2, %v3051_v61 }
 0x1f4   :  { %1371 = vst [vmem:[#allocation4 + $0x128] sm:$0xff] %v1307_v21  ;;  %1372 = vst [vmem:[#allocation4 + $0x130] sm:$0xff] %v1308_v24 }
 0x1f5   :  { %1373 = vst [vmem:[#allocation4 + $0x138] sm:$0xff] %v1309_v43  ;;  %1374 = vst [vmem:[#allocation4 + $0x140] sm:$0xff] %v1310_v20 }
 0x1f6   :  { %1375 = vst [vmem:[#allocation4 + $0x148] sm:$0xff] %v1311_v63  ;;  %1376 = vst [vmem:[#allocation4 + $0x150] sm:$0xff] %v1312_v57 }
 0x1f7   :  { %1377 = vst [vmem:[#allocation4 + $0x158] sm:$0xff] %v1313_v9  ;;  %1378 = vst [vmem:[#allocation4 + $0x160] sm:$0xff] %v1314_v62 }
 0x1f8   :  { %1379 = vst [vmem:[#allocation4 + $0x168] sm:$0xff] %v1315_v6  ;;  %1380 = vst [vmem:[#allocation4 + $0x170] sm:$0xff] %v1316_v29 }
 0x1f9   :  { %1381 = vst [vmem:[#allocation4 + $0x178] sm:$0xff] %v1317_v30  ;;  %1382 = vst [vmem:[#allocation4 + $0x180] sm:$0xff] %v1318_v53 }
 0x1fa   :  { %1383 = vst [vmem:[#allocation4 + $0x188] sm:$0xff] %v1319_v37  ;;  %1384 = vst [vmem:[#allocation4 + $0x190] sm:$0xff] %v1320_v13 }
 0x1fb   :  { %1385 = vst [vmem:[#allocation4 + $0x198] sm:$0xff] %v1321_v58  ;;  %1386 = vst [vmem:[#allocation4 + $0x1a0] sm:$0xff] %v1322_v41 }
 0x1fc   :  { %1387 = vst [vmem:[#allocation4 + $0x1a8] sm:$0xff] %v1323_v18  ;;  %1388 = vst [vmem:[#allocation4 + $0x1b0] sm:$0xff] %v1324_v31 }
 0x1fd   :  { %1389 = vst [vmem:[#allocation4 + $0x1b8] sm:$0xff] %v1325_v34  ;;  %1390 = vst [vmem:[#allocation4 + $0x1c0] sm:$0xff] %v1326_v14 }
 0x1fe   :  { %1391 = vst [vmem:[#allocation4 + $0x1c8] sm:$0xff] %v1327_v47  ;;  %1392 = vst [vmem:[#allocation4 + $0x1d0] sm:$0xff] %v1328_v28 }
 0x1ff   :  { %1393 = vst [vmem:[#allocation4 + $0x1d8] sm:$0xff] %v1329_v36  ;;  %1394 = vst [vmem:[#allocation4 + $0x1e0] sm:$0xff] %v1330_v4 }
 0x200   :  { %1395 = vst [vmem:[#allocation4 + $0x1e8] sm:$0xff] %v1331_v16  ;;  %1396 = vst [vmem:[#allocation4 + $0x1f0] sm:$0xff] %v1332_v12 }
 0x201   :  { %1945 = shalt.err (!%p1942_p4)
}
 0x202   :  { %s1958_s17 = smov 256   ;;  %s1959_s18 = smov 16  }
 0x203   :  { %1409 = dma.vmem_to_hbm [thread:$0]  %s3171_s15, 8192, %s3194_s5, [#allocation5], %s1958_s17, %s1958_s17, %s1959_s18  }
 0x204   :  { %1954 = dma.done.wait [#allocation5], 8192  }
 0x205   :  { %1955 = vsyncadd [#allocation5], 4294959104 }
 0x206   :  { %1413 = vsyncpa [#allocation5], 1 }

</bundles_post_ra>
